<compile_context>
chip_gen: v7x
topology: tpu7x:2x2x1
jax: 0.10.0
libtpu: 0.0.40
codegen_flags: <defaults>
</compile_context>

<pallas_src>
import functools

import jax
import jax.numpy as jnp
from jax.experimental import pallas as pl
from jax.experimental.pallas import tpu as pltpu


def _bilstm_chunk_kernel(xf_ref, xb_ref, len_ref, bias_f_ref, bias_b_ref,
                         whh_f_ref, whh_b_ref,
                         out_f_ref, out_b_ref,
                         hf_sc, cf_sc, hb_sc, cb_sc,
                         *, hidden, t_chunk, total_t):
    """Fused bidirectional LSTM recurrence over one (batch-shard, time-chunk) step.

    xf_ref     : (TC, Bs, 4H) bf16  precomputed x@W_ih^T, forward-time chunk c
    xb_ref     : (TC, Bs, 4H) bf16  same, but the chunk nc-1-c (backward stream)
    len_ref    : (Bs, 1)      int32 sequence lengths
    bias_*_ref : (1, 4H)      f32   b_ih + b_hh per direction
    whh_*_ref  : (H, 4H)      bf16  hidden->gate weights (transposed)
    out_f_ref  : (TC, Bs, H)  f32   forward outputs, chunk c (forward time order)
    out_b_ref  : (TC, Bs, H)  f32   backward outputs, chunk nc-1-c (forward time order)
    *_sc       : (Bs, H)      f32   carried hidden / cell state per direction
    """
    c = pl.program_id(1)          # time-chunk index (sequential axis)
    H = hidden

    @pl.when(c == 0)
    def _():
        hf_sc[...] = jnp.zeros_like(hf_sc)
        cf_sc[...] = jnp.zeros_like(cf_sc)
        hb_sc[...] = jnp.zeros_like(hb_sc)
        cb_sc[...] = jnp.zeros_like(cb_sc)

    lengths = len_ref[...]                      # (Bs, 1) int32
    whh_f = whh_f_ref[...]                      # (H, 4H) bf16
    whh_b = whh_b_ref[...]                      # (H, 4H) bf16
    bias_f = bias_f_ref[...]                    # (1, 4H) f32
    bias_b = bias_b_ref[...]                    # (1, 4H) f32
    chunk_start = c * t_chunk

    def cell(x_bf, h_prev, c_prev, whh, bias):
        # recurrent matmul on the MXU (bf16 operands, f32 accumulation)
        gates = jnp.dot(h_prev.astype(jnp.bfloat16), whh,
                        preferred_element_type=jnp.float32)        # (Bs, 4H) f32
        gates = gates + x_bf.astype(jnp.float32) + bias
        # PyTorch gate order: i, f, g, o
        i = jax.nn.sigmoid(gates[:, 0 * H:1 * H])
        f = jax.nn.sigmoid(gates[:, 1 * H:2 * H])
        g = jnp.tanh(gates[:, 2 * H:3 * H])
        o = jax.nn.sigmoid(gates[:, 3 * H:4 * H])
        c_new = f * c_prev + i * g
        h_new = o * jnp.tanh(c_new)
        return h_new, c_new

    def step(tau, carry):
        h_f, c_f, h_b, c_b = carry
        t = chunk_start + tau                   # forward real time / stream position

        # ---- forward direction: real time = t ----
        hf_new, cf_new = cell(xf_ref[tau], h_f, c_f, whh_f, bias_f)
        mask_f = t < lengths                    # (Bs, 1) bool
        out_f_ref[tau] = jnp.where(mask_f, hf_new, 0.0)
        h_f = jnp.where(mask_f, hf_new, h_f)
        c_f = jnp.where(mask_f, cf_new, c_f)

        # ---- backward direction: chunk nc-1-c is already loaded (index_map),
        #      so the row inside the chunk is t_chunk-1-tau and the real
        #      forward time is total_t-1-t.
        row_b = t_chunk - 1 - tau
        t_b = total_t - 1 - t
        hb_new, cb_new = cell(xb_ref[row_b], h_b, c_b, whh_b, bias_b)
        mask_b = t_b < lengths
        out_b_ref[row_b] = jnp.where(mask_b, hb_new, 0.0)
        h_b = jnp.where(mask_b, hb_new, h_b)
        c_b = jnp.where(mask_b, cb_new, c_b)

        return (h_f, c_f, h_b, c_b)

    carry0 = (hf_sc[...], cf_sc[...], hb_sc[...], cb_sc[...])
    h_f, c_f, h_b, c_b = jax.lax.fori_loop(
        0, t_chunk, step, carry0, unroll=min(8, t_chunk))

    hf_sc[...] = h_f
    cf_sc[...] = c_f
    hb_sc[...] = h_b
    cb_sc[...] = c_b


def _vmem_limit_bytes():
    """Per-generation scoped-VMEM limit: capacity minus headroom, capped."""
    try:
        info = pltpu.get_tpu_info()
        cap = getattr(info, "vmem_capacity_bytes", 64 << 20)
    except Exception:  # pragma: no cover - conservative fallback
        cap = 64 << 20
    return int(min(cap - (16 << 20), 112 << 20))


def _auto_t_chunk(T, Bs, H, vmem_limit):
    """Largest time-chunk fitting the VMEM budget (bf16 x-proj in, f32 out,
    2 directions, double-buffered streams, single-buffered weights)."""
    weight_bytes = 2 * H * 4 * H * 2                         # two bf16 (H,4H), Buffered(1)
    per_step = 2 * 2 * (Bs * 4 * H * 2 + Bs * H * 4)         # dirs * bufs * (in + out)
    budget = max(vmem_limit - weight_bytes - (4 << 20), per_step)
    return int(max(1, min(budget // per_step, T, 64)))


def lstm_encoder_forward(sequences, lengths, params, *,
                         t_chunk=None, batch_shards=1):
    """LSTMEncoder.forward: embed -> hoisted input GEMM -> fused bi-LSTM kernel.

    batch_shards=2 on v7x splits the batch across both TensorCores via a
    leading "parallel" grid axis (requires (B / batch_shards) % 8 == 0).
    """
    emb = params["embedding"]                              # (V, E)
    x = emb[sequences].astype(jnp.float32)                 # (T, B, E)  glue: gather
    T, B, E = x.shape
    H = params["w_hh_fwd"].shape[1]
    lengths_2d = lengths.astype(jnp.int32).reshape(B, 1)   # (B, 1)

    if batch_shards < 1 or B % batch_shards or (
            batch_shards > 1 and (B // batch_shards) % 8):
        batch_shards = 1                                   # fall back: keep blocks legal
    Bs = B // batch_shards

    vmem_limit = _vmem_limit_bytes()
    if t_chunk is None:
        t_chunk = _auto_t_chunk(T, Bs, H, vmem_limit)
    tc = max(1, min(t_chunk, T))
    Tp = ((T + tc - 1) // tc) * tc
    nc = Tp // tc
    pad = Tp - T

    # ---- hoisted input projection: one big bf16 GEMM per direction (f32 acc),
    #      streamed to the kernel in bf16 (halves HBM traffic & VMEM tiles) ----
    x_bf = x.astype(jnp.bfloat16)

    def input_proj(w_ih):
        wt = jnp.transpose(w_ih).astype(jnp.bfloat16)      # (E, 4H)
        xp = jnp.einsum("tbe,eg->tbg", x_bf, wt,
                        preferred_element_type=jnp.float32)
        return xp.astype(jnp.bfloat16)                     # (T, B, 4H) bf16 stream

    xp_f = input_proj(params["w_ih_fwd"])
    xp_b = input_proj(params["w_ih_bwd"])
    if pad:
        zeros = jnp.zeros((pad, B, 4 * H), jnp.bfloat16)   # masked out by lengths
        xp_f = jnp.concatenate([xp_f, zeros], axis=0)
        xp_b = jnp.concatenate([xp_b, zeros], axis=0)

    bias_f = (params["b_ih_fwd"] + params["b_hh_fwd"]).astype(jnp.float32).reshape(1, 4 * H)
    bias_b = (params["b_ih_bwd"] + params["b_hh_bwd"]).astype(jnp.float32).reshape(1, 4 * H)
    whh_f = jnp.transpose(params["w_hh_fwd"]).astype(jnp.bfloat16)   # (H, 4H)
    whh_b = jnp.transpose(params["w_hh_bwd"]).astype(jnp.bfloat16)   # (H, 4H)

    kernel = functools.partial(_bilstm_chunk_kernel,
                               hidden=H, t_chunk=tc, total_t=Tp)

    # Constant-index blocks: single-buffered (no point double-buffering them).
    const = dict(pipeline_mode=pl.Buffered(1))

    out_f, out_b = pl.pallas_call(
        kernel,
        out_shape=(jax.ShapeDtypeStruct((Tp, B, H), jnp.float32),
                   jax.ShapeDtypeStruct((Tp, B, H), jnp.float32)),
        grid=(batch_shards, nc),
        in_specs=[
            # x-proj forward chunk c
            pl.BlockSpec((tc, Bs, 4 * H), lambda b, c: (c, b, 0)),
            # x-proj backward: time reversal expressed in the index_map (no flip)
            pl.BlockSpec((tc, Bs, 4 * H), lambda b, c: (nc - 1 - c, b, 0)),
            pl.BlockSpec((Bs, 1), lambda b, c: (b, 0), **const),        # lengths
            pl.BlockSpec((1, 4 * H), lambda b, c: (0, 0), **const),     # bias fwd (f32)
            pl.BlockSpec((1, 4 * H), lambda b, c: (0, 0), **const),     # bias bwd (f32)
            pl.BlockSpec((H, 4 * H), lambda b, c: (0, 0), **const),     # W_hh_fwd^T bf16
            pl.BlockSpec((H, 4 * H), lambda b, c: (0, 0), **const),     # W_hh_bwd^T bf16
        ],
        out_specs=(
            pl.BlockSpec((tc, Bs, H), lambda b, c: (c, b, 0)),           # fwd outputs
            pl.BlockSpec((tc, Bs, H), lambda b, c: (nc - 1 - c, b, 0)),  # bwd outputs
        ),
        scratch_shapes=[
            pltpu.VMEM((Bs, H), jnp.float32),   # h fwd
            pltpu.VMEM((Bs, H), jnp.float32),   # c fwd
            pltpu.VMEM((Bs, H), jnp.float32),   # h bwd
            pltpu.VMEM((Bs, H), jnp.float32),   # c bwd
        ],
        compiler_params=pltpu.CompilerParams(
            dimension_semantics=("parallel", "arbitrary"),   # batch shards ∥, time serial
            vmem_limit_bytes=vmem_limit),
    )(xp_f, xp_b, lengths_2d, bias_f, bias_b, whh_f, whh_b)

    # Both halves are already in forward time order (reversal handled by the
    # index_map).  Bidirectional concat on the feature axis, as torch.nn.LSTM.
    return jnp.concatenate([out_f[:T], out_b[:T]], axis=2)   # (T, B, 2H)


def lstm_encoder_reference(sequences, lengths, params):
    """Pure-JAX f32 reference (pack/pad_packed semantics) for validation."""
    emb = params["embedding"]
    x = emb[sequences].astype(jnp.float32)                 # (T, B, E)
    T, B, _ = x.shape
    H = params["w_hh_fwd"].shape[1]
    lengths = lengths.astype(jnp.int32)

    def run_dir(w_ih, w_hh, b_ih, b_hh, reverse):
        def step(carry, inp):
            h, c = carry
            x_t, t = inp
            gates = x_t @ w_ih.T + h @ w_hh.T + b_ih + b_hh
            i = jax.nn.sigmoid(gates[:, 0 * H:1 * H])
            f = jax.nn.sigmoid(gates[:, 1 * H:2 * H])
            g = jnp.tanh(gates[:, 2 * H:3 * H])
            o = jax.nn.sigmoid(gates[:, 3 * H:4 * H])
            c_new = f * c + i * g
            h_new = o * jnp.tanh(c_new)
            mask = (t < lengths)[:, None]
            h = jnp.where(mask, h_new, h)
            c = jnp.where(mask, c_new, c)
            out = jnp.where(mask, h_new, 0.0)
            return (h, c), out

        xs, ts = x, jnp.arange(T)
        if reverse:
            xs, ts = xs[::-1], ts[::-1]
        init = (jnp.zeros((B, H), jnp.float32), jnp.zeros((B, H), jnp.float32))
        _, outs = jax.lax.scan(step, init, (xs, ts))
        return outs[::-1] if reverse else outs

    of = run_dir(params["w_ih_fwd"], params["w_hh_fwd"],
                 params["b_ih_fwd"], params["b_hh_fwd"], False)
    ob = run_dir(params["w_ih_bwd"], params["w_hh_bwd"],
                 params["b_ih_bwd"], params["b_hh_bwd"], True)
    return jnp.concatenate([of, ob], axis=2)


def make_params(key, vocab_size, embed_dim, hidden_dim):
    """Deterministic synthetic parameters (PyTorch-style U(-1/sqrt(H), 1/sqrt(H)))."""
    ks = jax.random.split(key, 9)
    s = 1.0 / jnp.sqrt(jnp.float32(hidden_dim))
    u = lambda k, shape: jax.random.uniform(k, shape, jnp.float32, -s, s)
    return {
        "embedding": jax.random.normal(ks[0], (vocab_size, embed_dim), jnp.float32),
        "w_ih_fwd": u(ks[1], (4 * hidden_dim, embed_dim)),
        "w_hh_fwd": u(ks[2], (4 * hidden_dim, hidden_dim)),
        "b_ih_fwd": u(ks[3], (4 * hidden_dim,)),
        "b_hh_fwd": u(ks[4], (4 * hidden_dim,)),
        "w_ih_bwd": u(ks[5], (4 * hidden_dim, embed_dim)),
        "w_hh_bwd": u(ks[6], (4 * hidden_dim, hidden_dim)),
        "b_ih_bwd": u(ks[7], (4 * hidden_dim,)),
        "b_hh_bwd": u(ks[8], (4 * hidden_dim,)),
    }


if __name__ == "__main__":
    T, B = 8, 2           # seq_len, batch
    VOCAB, E, H = 50, 32, 32

    key = jax.random.PRNGKey(0)
    kp, kseq = jax.random.split(key)
    params = make_params(kp, VOCAB, E, H)

    sequences = jax.random.randint(kseq, (T, B), 0, VOCAB, dtype=jnp.int32)
    lengths = jnp.array([8, 5], dtype=jnp.int32)

    out = lstm_encoder_forward(sequences, lengths, params)   # (T, B, 2H)
    out = jax.block_until_ready(out)

    assert out.shape == (T, B, 2 * H), out.shape
    assert out.dtype == jnp.float32
    # padded positions (t >= length) must be exactly zero, as with pad_packed_sequence
    assert bool(jnp.all(out[5:, 1, :] == 0.0))

    # validate against the pure-f32 reference (bf16 MXU operands + bf16
    # x-projection streaming => loose tolerance)
    ref = jax.block_until_ready(lstm_encoder_reference(sequences, lengths, params))
    max_err = float(jnp.max(jnp.abs(out - ref)))
    assert max_err < 5e-2, max_err

    print("KERNEL_OK")
</pallas_src>

<mosaic_0001>
module attributes {stable_mosaic.version = 11 : i64} {
  func.func @_bilstm_chunk_kernel(%arg0: i32, %arg1: i32, %arg2: memref<8x2x128xbf16, #tpu.memory_space<vmem>>, %arg3: memref<8x2x128xbf16, #tpu.memory_space<vmem>>, %arg4: memref<2x1xi32, #tpu.memory_space<vmem>>, %arg5: memref<1x128xf32, #tpu.memory_space<vmem>>, %arg6: memref<1x128xf32, #tpu.memory_space<vmem>>, %arg7: memref<32x128xbf16, #tpu.memory_space<vmem>>, %arg8: memref<32x128xbf16, #tpu.memory_space<vmem>>, %arg9: memref<8x2x32xf32, #tpu.memory_space<vmem>>, %arg10: memref<8x2x32xf32, #tpu.memory_space<vmem>>, %arg11: memref<2x32xf32, #tpu.memory_space<vmem>>, %arg12: memref<2x32xf32, #tpu.memory_space<vmem>>, %arg13: memref<2x32xf32, #tpu.memory_space<vmem>>, %arg14: memref<2x32xf32, #tpu.memory_space<vmem>>) attributes {dimension_semantics = [#tpu.dimension_semantics<parallel>, #tpu.dimension_semantics<arbitrary>], iteration_bounds = array<i64: 1, 1>, scalar_prefetch = 0 : i64, scratch_operands = 4 : i64, tpu.core_type = #tpu.core_type<tc>, window_params = [{transform_indices = @transform_0, window_bounds = array<i64: 8, 2, 128>}, {transform_indices = @transform_1, window_bounds = array<i64: 8, 2, 128>}, {pipeline_mode = #tpu.pipeline_mode<synchronous>, transform_indices = @transform_2, window_bounds = array<i64: 2, 1>}, {pipeline_mode = #tpu.pipeline_mode<synchronous>, transform_indices = @transform_3, window_bounds = array<i64: 1, 128>}, {pipeline_mode = #tpu.pipeline_mode<synchronous>, transform_indices = @transform_4, window_bounds = array<i64: 1, 128>}, {pipeline_mode = #tpu.pipeline_mode<synchronous>, transform_indices = @transform_5, window_bounds = array<i64: 32, 128>}, {pipeline_mode = #tpu.pipeline_mode<synchronous>, transform_indices = @transform_6, window_bounds = array<i64: 32, 128>}, {transform_indices = @transform_7, window_bounds = array<i64: 8, 2, 32>}, {transform_indices = @transform_8, window_bounds = array<i64: 8, 2, 32>}]} {
    %c0_i32 = arith.constant 0 : i32
    %0 = arith.cmpi eq, %arg1, %c0_i32 : i32
    %1 = arith.extui %0 : i1 to i32
    %c0_i32_0 = arith.constant 0 : i32
    %2 = arith.cmpi ne, %1, %c0_i32_0 : i32
    scf.if %2 {
      %cst_187 = arith.constant 0.000000e+00 : f32
      %841 = vector.broadcast %cst_187 : f32 to vector<2x32xf32>
      %c0_188 = arith.constant 0 : index
      %c0_189 = arith.constant 0 : index
      %842 = vector.load %arg11[%c0_188, %c0_189] : memref<2x32xf32, #tpu.memory_space<vmem>>, vector<2x32xf32>
      tpu.vector_store %arg11[%c0_188, %c0_189], %841 {strides = array<i32>} : memref<2x32xf32, #tpu.memory_space<vmem>>, vector<2x32xf32>,
      %cst_190 = arith.constant 0.000000e+00 : f32
      %843 = vector.broadcast %cst_190 : f32 to vector<2x32xf32>
      %c0_191 = arith.constant 0 : index
      %c0_192 = arith.constant 0 : index
      %844 = vector.load %arg12[%c0_191, %c0_192] : memref<2x32xf32, #tpu.memory_space<vmem>>, vector<2x32xf32>
      tpu.vector_store %arg12[%c0_191, %c0_192], %843 {strides = array<i32>} : memref<2x32xf32, #tpu.memory_space<vmem>>, vector<2x32xf32>,
      %cst_193 = arith.constant 0.000000e+00 : f32
      %845 = vector.broadcast %cst_193 : f32 to vector<2x32xf32>
      %c0_194 = arith.constant 0 : index
      %c0_195 = arith.constant 0 : index
      %846 = vector.load %arg13[%c0_194, %c0_195] : memref<2x32xf32, #tpu.memory_space<vmem>>, vector<2x32xf32>
      tpu.vector_store %arg13[%c0_194, %c0_195], %845 {strides = array<i32>} : memref<2x32xf32, #tpu.memory_space<vmem>>, vector<2x32xf32>,
      %cst_196 = arith.constant 0.000000e+00 : f32
      %847 = vector.broadcast %cst_196 : f32 to vector<2x32xf32>
      %c0_197 = arith.constant 0 : index
      %c0_198 = arith.constant 0 : index
      %848 = vector.load %arg14[%c0_197, %c0_198] : memref<2x32xf32, #tpu.memory_space<vmem>>, vector<2x32xf32>
      tpu.vector_store %arg14[%c0_197, %c0_198], %847 {strides = array<i32>} : memref<2x32xf32, #tpu.memory_space<vmem>>, vector<2x32xf32>,
    } else {
    }
    %c0 = arith.constant 0 : index
    %c0_1 = arith.constant 0 : index
    %3 = vector.load %arg4[%c0, %c0_1] : memref<2x1xi32, #tpu.memory_space<vmem>>, vector<2x1xi32>
    %c0_2 = arith.constant 0 : index
    %c0_3 = arith.constant 0 : index
    %4 = vector.load %arg7[%c0_2, %c0_3] : memref<32x128xbf16, #tpu.memory_space<vmem>>, vector<32x128xbf16>
    %c0_4 = arith.constant 0 : index
    %c0_5 = arith.constant 0 : index
    %5 = vector.load %arg8[%c0_4, %c0_5] : memref<32x128xbf16, #tpu.memory_space<vmem>>, vector<32x128xbf16>
    %c0_6 = arith.constant 0 : index
    %c0_7 = arith.constant 0 : index
    %6 = vector.load %arg5[%c0_6, %c0_7] : memref<1x128xf32, #tpu.memory_space<vmem>>, vector<1x128xf32>
    %c0_8 = arith.constant 0 : index
    %c0_9 = arith.constant 0 : index
    %7 = vector.load %arg6[%c0_8, %c0_9] : memref<1x128xf32, #tpu.memory_space<vmem>>, vector<1x128xf32>
    %c8_i32 = arith.constant 8 : i32
    %8 = arith.muli %arg1, %c8_i32 : i32
    %c0_10 = arith.constant 0 : index
    %c0_11 = arith.constant 0 : index
    %9 = vector.load %arg11[%c0_10, %c0_11] : memref<2x32xf32, #tpu.memory_space<vmem>>, vector<2x32xf32>
    %c0_12 = arith.constant 0 : index
    %c0_13 = arith.constant 0 : index
    %10 = vector.load %arg12[%c0_12, %c0_13] : memref<2x32xf32, #tpu.memory_space<vmem>>, vector<2x32xf32>
    %c0_14 = arith.constant 0 : index
    %c0_15 = arith.constant 0 : index
    %11 = vector.load %arg13[%c0_14, %c0_15] : memref<2x32xf32, #tpu.memory_space<vmem>>, vector<2x32xf32>
    %c0_16 = arith.constant 0 : index
    %c0_17 = arith.constant 0 : index
    %12 = vector.load %arg14[%c0_16, %c0_17] : memref<2x32xf32, #tpu.memory_space<vmem>>, vector<2x32xf32>
    %c0_i32_18 = arith.constant 0 : i32
    %13 = arith.addi %8, %c0_i32_18 : i32
    %14 = arith.index_cast %c0_i32_18 : i32 to index
    %c0_19 = arith.constant 0 : index
    %c0_20 = arith.constant 0 : index
    %15 = vector.load %arg2[%14, %c0_19, %c0_20] : memref<8x2x128xbf16, #tpu.memory_space<vmem>>, vector<1x2x128xbf16>
    %16 = vector.shape_cast %15 : vector<1x2x128xbf16> to vector<2x128xbf16>
    %17 = arith.truncf %9 : vector<2x32xf32> to vector<2x32xbf16>
    %cst = arith.constant dense<0.000000e+00> : vector<2x128xf32>
    %18 = tpu.matmul %17, %4, %cst {dimension_numbers = #tpu.dot_dimension_numbers<[1], [0], [0], [1], [0, 0, 1, 1], [], []>} : vector<2x32xbf16>, vector<32x128xbf16>, vector<2x128xf32> -> vector<2x128xf32>
    %19 = arith.extf %16 : vector<2x128xbf16> to vector<2x128xf32>
    %20 = arith.addf %18, %19 : vector<2x128xf32>
    %21 = vector.broadcast %6 : vector<1x128xf32> to vector<2x128xf32>
    %22 = arith.addf %20, %21 : vector<2x128xf32>
    %23 = vector.extract_strided_slice %22 {offsets = [0, 0], sizes = [2, 32], strides = [1, 1]} : vector<2x128xf32> to vector<2x32xf32>
    %24 = arith.negf %23 : vector<2x32xf32>
    %25 = math.exp %24 : vector<2x32xf32>
    %cst_21 = arith.constant 1.000000e+00 : f32
    %26 = vector.broadcast %cst_21 : f32 to vector<2x32xf32>
    %27 = arith.addf %26, %25 : vector<2x32xf32>
    %28 = arith.divf %26, %27 : vector<2x32xf32>
    %29 = vector.extract_strided_slice %22 {offsets = [0, 32], sizes = [2, 32], strides = [1, 1]} : vector<2x128xf32> to vector<2x32xf32>
    %30 = arith.negf %29 : vector<2x32xf32>
    %31 = math.exp %30 : vector<2x32xf32>
    %cst_22 = arith.constant 1.000000e+00 : f32
    %32 = vector.broadcast %cst_22 : f32 to vector<2x32xf32>
    %33 = arith.addf %32, %31 : vector<2x32xf32>
    %34 = arith.divf %32, %33 : vector<2x32xf32>
    %35 = vector.extract_strided_slice %22 {offsets = [0, 64], sizes = [2, 32], strides = [1, 1]} : vector<2x128xf32> to vector<2x32xf32>
    %36 = math.tanh %35 : vector<2x32xf32>
    %37 = vector.extract_strided_slice %22 {offsets = [0, 96], sizes = [2, 32], strides = [1, 1]} : vector<2x128xf32> to vector<2x32xf32>
    %38 = arith.negf %37 : vector<2x32xf32>
    %39 = math.exp %38 : vector<2x32xf32>
    %cst_23 = arith.constant 1.000000e+00 : f32
    %40 = vector.broadcast %cst_23 : f32 to vector<2x32xf32>
    %41 = arith.addf %40, %39 : vector<2x32xf32>
    %42 = arith.divf %40, %41 : vector<2x32xf32>
    %43 = arith.mulf %34, %10 : vector<2x32xf32>
    %44 = arith.mulf %28, %36 : vector<2x32xf32>
    %45 = arith.addf %43, %44 : vector<2x32xf32>
    %46 = math.tanh %45 : vector<2x32xf32>
    %47 = arith.mulf %42, %46 : vector<2x32xf32>
    %48 = vector.broadcast %13 : i32 to vector<2x1xi32>
    %49 = arith.cmpi slt, %48, %3 : vector<2x1xi32>
    %cst_24 = arith.constant 0.000000e+00 : f32
    %50 = vector.shape_cast %49 : vector<2x1xi1> to vector<2x1xi1>
    %51 = vector.broadcast %50 : vector<2x1xi1> to vector<2x32xi1>
    %52 = vector.broadcast %cst_24 : f32 to vector<2x32xf32>
    %53 = arith.select %51, %47, %52 : vector<2x32xi1>, vector<2x32xf32>
    %54 = arith.index_cast %c0_i32_18 : i32 to index
    %c0_25 = arith.constant 0 : index
    %c0_26 = arith.constant 0 : index
    %55 = vector.load %arg9[%54, %c0_25, %c0_26] : memref<8x2x32xf32, #tpu.memory_space<vmem>>, vector<1x2x32xf32>
    %56 = vector.shape_cast %55 : vector<1x2x32xf32> to vector<2x32xf32>
    %57 = vector.shape_cast %53 : vector<2x32xf32> to vector<1x2x32xf32>
    tpu.vector_store %arg9[%54, %c0_25, %c0_26], %57 {strides = array<i32>} : memref<8x2x32xf32, #tpu.memory_space<vmem>>, vector<1x2x32xf32>,
    %58 = vector.shape_cast %49 : vector<2x1xi1> to vector<2x1xi1>
    %59 = vector.broadcast %58 : vector<2x1xi1> to vector<2x32xi1>
    %60 = arith.select %59, %47, %9 : vector<2x32xi1>, vector<2x32xf32>
    %61 = vector.shape_cast %49 : vector<2x1xi1> to vector<2x1xi1>
    %62 = vector.broadcast %61 : vector<2x1xi1> to vector<2x32xi1>
    %63 = arith.select %62, %45, %10 : vector<2x32xi1>, vector<2x32xf32>
    %c7_i32 = arith.constant 7 : i32
    %64 = arith.subi %c7_i32, %c0_i32_18 : i32
    %c7_i32_27 = arith.constant 7 : i32
    %65 = arith.subi %c7_i32_27, %13 : i32
    %66 = arith.index_cast %64 : i32 to index
    %c0_28 = arith.constant 0 : index
    %c0_29 = arith.constant 0 : index
    %67 = vector.load %arg3[%66, %c0_28, %c0_29] : memref<8x2x128xbf16, #tpu.memory_space<vmem>>, vector<1x2x128xbf16>
    %68 = vector.shape_cast %67 : vector<1x2x128xbf16> to vector<2x128xbf16>
    %69 = arith.truncf %11 : vector<2x32xf32> to vector<2x32xbf16>
    %cst_30 = arith.constant dense<0.000000e+00> : vector<2x128xf32>
    %70 = tpu.matmul %69, %5, %cst_30 {dimension_numbers = #tpu.dot_dimension_numbers<[1], [0], [0], [1], [0, 0, 1, 1], [], []>} : vector<2x32xbf16>, vector<32x128xbf16>, vector<2x128xf32> -> vector<2x128xf32>
    %71 = arith.extf %68 : vector<2x128xbf16> to vector<2x128xf32>
    %72 = arith.addf %70, %71 : vector<2x128xf32>
    %73 = vector.broadcast %7 : vector<1x128xf32> to vector<2x128xf32>
    %74 = arith.addf %72, %73 : vector<2x128xf32>
    %75 = vector.extract_strided_slice %74 {offsets = [0, 0], sizes = [2, 32], strides = [1, 1]} : vector<2x128xf32> to vector<2x32xf32>
    %76 = arith.negf %75 : vector<2x32xf32>
    %77 = math.exp %76 : vector<2x32xf32>
    %cst_31 = arith.constant 1.000000e+00 : f32
    %78 = vector.broadcast %cst_31 : f32 to vector<2x32xf32>
    %79 = arith.addf %78, %77 : vector<2x32xf32>
    %80 = arith.divf %78, %79 : vector<2x32xf32>
    %81 = vector.extract_strided_slice %74 {offsets = [0, 32], sizes = [2, 32], strides = [1, 1]} : vector<2x128xf32> to vector<2x32xf32>
    %82 = arith.negf %81 : vector<2x32xf32>
    %83 = math.exp %82 : vector<2x32xf32>
    %cst_32 = arith.constant 1.000000e+00 : f32
    %84 = vector.broadcast %cst_32 : f32 to vector<2x32xf32>
    %85 = arith.addf %84, %83 : vector<2x32xf32>
    %86 = arith.divf %84, %85 : vector<2x32xf32>
    %87 = vector.extract_strided_slice %74 {offsets = [0, 64], sizes = [2, 32], strides = [1, 1]} : vector<2x128xf32> to vector<2x32xf32>
    %88 = math.tanh %87 : vector<2x32xf32>
    %89 = vector.extract_strided_slice %74 {offsets = [0, 96], sizes = [2, 32], strides = [1, 1]} : vector<2x128xf32> to vector<2x32xf32>
    %90 = arith.negf %89 : vector<2x32xf32>
    %91 = math.exp %90 : vector<2x32xf32>
    %cst_33 = arith.constant 1.000000e+00 : f32
    %92 = vector.broadcast %cst_33 : f32 to vector<2x32xf32>
    %93 = arith.addf %92, %91 : vector<2x32xf32>
    %94 = arith.divf %92, %93 : vector<2x32xf32>
    %95 = arith.mulf %86, %12 : vector<2x32xf32>
    %96 = arith.mulf %80, %88 : vector<2x32xf32>
    %97 = arith.addf %95, %96 : vector<2x32xf32>
    %98 = math.tanh %97 : vector<2x32xf32>
    %99 = arith.mulf %94, %98 : vector<2x32xf32>
    %100 = vector.broadcast %65 : i32 to vector<2x1xi32>
    %101 = arith.cmpi slt, %100, %3 : vector<2x1xi32>
    %cst_34 = arith.constant 0.000000e+00 : f32
    %102 = vector.shape_cast %101 : vector<2x1xi1> to vector<2x1xi1>
    %103 = vector.broadcast %102 : vector<2x1xi1> to vector<2x32xi1>
    %104 = vector.broadcast %cst_34 : f32 to vector<2x32xf32>
    %105 = arith.select %103, %99, %104 : vector<2x32xi1>, vector<2x32xf32>
    %106 = arith.index_cast %64 : i32 to index
    %c0_35 = arith.constant 0 : index
    %c0_36 = arith.constant 0 : index
    %107 = vector.load %arg10[%106, %c0_35, %c0_36] : memref<8x2x32xf32, #tpu.memory_space<vmem>>, vector<1x2x32xf32>
    %108 = vector.shape_cast %107 : vector<1x2x32xf32> to vector<2x32xf32>
    %109 = vector.shape_cast %105 : vector<2x32xf32> to vector<1x2x32xf32>
    tpu.vector_store %arg10[%106, %c0_35, %c0_36], %109 {strides = array<i32>} : memref<8x2x32xf32, #tpu.memory_space<vmem>>, vector<1x2x32xf32>,
    %110 = vector.shape_cast %101 : vector<2x1xi1> to vector<2x1xi1>
    %111 = vector.broadcast %110 : vector<2x1xi1> to vector<2x32xi1>
    %112 = arith.select %111, %99, %11 : vector<2x32xi1>, vector<2x32xf32>
    %113 = vector.shape_cast %101 : vector<2x1xi1> to vector<2x1xi1>
    %114 = vector.broadcast %113 : vector<2x1xi1> to vector<2x32xi1>
    %115 = arith.select %114, %97, %12 : vector<2x32xi1>, vector<2x32xf32>
    %c1_i32 = arith.constant 1 : i32
    %116 = arith.addi %8, %c1_i32 : i32
    %117 = arith.index_cast %c1_i32 : i32 to index
    %c0_37 = arith.constant 0 : index
    %c0_38 = arith.constant 0 : index
    %118 = vector.load %arg2[%117, %c0_37, %c0_38] : memref<8x2x128xbf16, #tpu.memory_space<vmem>>, vector<1x2x128xbf16>
    %119 = vector.shape_cast %118 : vector<1x2x128xbf16> to vector<2x128xbf16>
    %120 = arith.truncf %60 : vector<2x32xf32> to vector<2x32xbf16>
    %cst_39 = arith.constant dense<0.000000e+00> : vector<2x128xf32>
    %121 = tpu.matmul %120, %4, %cst_39 {dimension_numbers = #tpu.dot_dimension_numbers<[1], [0], [0], [1], [0, 0, 1, 1], [], []>} : vector<2x32xbf16>, vector<32x128xbf16>, vector<2x128xf32> -> vector<2x128xf32>
    %122 = arith.extf %119 : vector<2x128xbf16> to vector<2x128xf32>
    %123 = arith.addf %121, %122 : vector<2x128xf32>
    %124 = vector.broadcast %6 : vector<1x128xf32> to vector<2x128xf32>
    %125 = arith.addf %123, %124 : vector<2x128xf32>
    %126 = vector.extract_strided_slice %125 {offsets = [0, 0], sizes = [2, 32], strides = [1, 1]} : vector<2x128xf32> to vector<2x32xf32>
    %127 = arith.negf %126 : vector<2x32xf32>
    %128 = math.exp %127 : vector<2x32xf32>
    %cst_40 = arith.constant 1.000000e+00 : f32
    %129 = vector.broadcast %cst_40 : f32 to vector<2x32xf32>
    %130 = arith.addf %129, %128 : vector<2x32xf32>
    %131 = arith.divf %129, %130 : vector<2x32xf32>
    %132 = vector.extract_strided_slice %125 {offsets = [0, 32], sizes = [2, 32], strides = [1, 1]} : vector<2x128xf32> to vector<2x32xf32>
    %133 = arith.negf %132 : vector<2x32xf32>
    %134 = math.exp %133 : vector<2x32xf32>
    %cst_41 = arith.constant 1.000000e+00 : f32
    %135 = vector.broadcast %cst_41 : f32 to vector<2x32xf32>
    %136 = arith.addf %135, %134 : vector<2x32xf32>
    %137 = arith.divf %135, %136 : vector<2x32xf32>
    %138 = vector.extract_strided_slice %125 {offsets = [0, 64], sizes = [2, 32], strides = [1, 1]} : vector<2x128xf32> to vector<2x32xf32>
    %139 = math.tanh %138 : vector<2x32xf32>
    %140 = vector.extract_strided_slice %125 {offsets = [0, 96], sizes = [2, 32], strides = [1, 1]} : vector<2x128xf32> to vector<2x32xf32>
    %141 = arith.negf %140 : vector<2x32xf32>
    %142 = math.exp %141 : vector<2x32xf32>
    %cst_42 = arith.constant 1.000000e+00 : f32
    %143 = vector.broadcast %cst_42 : f32 to vector<2x32xf32>
    %144 = arith.addf %143, %142 : vector<2x32xf32>
    %145 = arith.divf %143, %144 : vector<2x32xf32>
    %146 = arith.mulf %137, %63 : vector<2x32xf32>
    %147 = arith.mulf %131, %139 : vector<2x32xf32>
    %148 = arith.addf %146, %147 : vector<2x32xf32>
    %149 = math.tanh %148 : vector<2x32xf32>
    %150 = arith.mulf %145, %149 : vector<2x32xf32>
    %151 = vector.broadcast %116 : i32 to vector<2x1xi32>
    %152 = arith.cmpi slt, %151, %3 : vector<2x1xi32>
    %cst_43 = arith.constant 0.000000e+00 : f32
    %153 = vector.shape_cast %152 : vector<2x1xi1> to vector<2x1xi1>
    %154 = vector.broadcast %153 : vector<2x1xi1> to vector<2x32xi1>
    %155 = vector.broadcast %cst_43 : f32 to vector<2x32xf32>
    %156 = arith.select %154, %150, %155 : vector<2x32xi1>, vector<2x32xf32>
    %157 = arith.index_cast %c1_i32 : i32 to index
    %c0_44 = arith.constant 0 : index
    %c0_45 = arith.constant 0 : index
    %158 = vector.load %arg9[%157, %c0_44, %c0_45] : memref<8x2x32xf32, #tpu.memory_space<vmem>>, vector<1x2x32xf32>
    %159 = vector.shape_cast %158 : vector<1x2x32xf32> to vector<2x32xf32>
    %160 = vector.shape_cast %156 : vector<2x32xf32> to vector<1x2x32xf32>
    tpu.vector_store %arg9[%157, %c0_44, %c0_45], %160 {strides = array<i32>} : memref<8x2x32xf32, #tpu.memory_space<vmem>>, vector<1x2x32xf32>,
    %161 = vector.shape_cast %152 : vector<2x1xi1> to vector<2x1xi1>
    %162 = vector.broadcast %161 : vector<2x1xi1> to vector<2x32xi1>
    %163 = arith.select %162, %150, %60 : vector<2x32xi1>, vector<2x32xf32>
    %164 = vector.shape_cast %152 : vector<2x1xi1> to vector<2x1xi1>
    %165 = vector.broadcast %164 : vector<2x1xi1> to vector<2x32xi1>
    %166 = arith.select %165, %148, %63 : vector<2x32xi1>, vector<2x32xf32>
    %c7_i32_46 = arith.constant 7 : i32
    %167 = arith.subi %c7_i32_46, %c1_i32 : i32
    %c7_i32_47 = arith.constant 7 : i32
    %168 = arith.subi %c7_i32_47, %116 : i32
    %169 = arith.index_cast %167 : i32 to index
    %c0_48 = arith.constant 0 : index
    %c0_49 = arith.constant 0 : index
    %170 = vector.load %arg3[%169, %c0_48, %c0_49] : memref<8x2x128xbf16, #tpu.memory_space<vmem>>, vector<1x2x128xbf16>
    %171 = vector.shape_cast %170 : vector<1x2x128xbf16> to vector<2x128xbf16>
    %172 = arith.truncf %112 : vector<2x32xf32> to vector<2x32xbf16>
    %cst_50 = arith.constant dense<0.000000e+00> : vector<2x128xf32>
    %173 = tpu.matmul %172, %5, %cst_50 {dimension_numbers = #tpu.dot_dimension_numbers<[1], [0], [0], [1], [0, 0, 1, 1], [], []>} : vector<2x32xbf16>, vector<32x128xbf16>, vector<2x128xf32> -> vector<2x128xf32>
    %174 = arith.extf %171 : vector<2x128xbf16> to vector<2x128xf32>
    %175 = arith.addf %173, %174 : vector<2x128xf32>
    %176 = vector.broadcast %7 : vector<1x128xf32> to vector<2x128xf32>
    %177 = arith.addf %175, %176 : vector<2x128xf32>
    %178 = vector.extract_strided_slice %177 {offsets = [0, 0], sizes = [2, 32], strides = [1, 1]} : vector<2x128xf32> to vector<2x32xf32>
    %179 = arith.negf %178 : vector<2x32xf32>
    %180 = math.exp %179 : vector<2x32xf32>
    %cst_51 = arith.constant 1.000000e+00 : f32
    %181 = vector.broadcast %cst_51 : f32 to vector<2x32xf32>
    %182 = arith.addf %181, %180 : vector<2x32xf32>
    %183 = arith.divf %181, %182 : vector<2x32xf32>
    %184 = vector.extract_strided_slice %177 {offsets = [0, 32], sizes = [2, 32], strides = [1, 1]} : vector<2x128xf32> to vector<2x32xf32>
    %185 = arith.negf %184 : vector<2x32xf32>
    %186 = math.exp %185 : vector<2x32xf32>
    %cst_52 = arith.constant 1.000000e+00 : f32
    %187 = vector.broadcast %cst_52 : f32 to vector<2x32xf32>
    %188 = arith.addf %187, %186 : vector<2x32xf32>
    %189 = arith.divf %187, %188 : vector<2x32xf32>
    %190 = vector.extract_strided_slice %177 {offsets = [0, 64], sizes = [2, 32], strides = [1, 1]} : vector<2x128xf32> to vector<2x32xf32>
    %191 = math.tanh %190 : vector<2x32xf32>
    %192 = vector.extract_strided_slice %177 {offsets = [0, 96], sizes = [2, 32], strides = [1, 1]} : vector<2x128xf32> to vector<2x32xf32>
    %193 = arith.negf %192 : vector<2x32xf32>
    %194 = math.exp %193 : vector<2x32xf32>
    %cst_53 = arith.constant 1.000000e+00 : f32
    %195 = vector.broadcast %cst_53 : f32 to vector<2x32xf32>
    %196 = arith.addf %195, %194 : vector<2x32xf32>
    %197 = arith.divf %195, %196 : vector<2x32xf32>
    %198 = arith.mulf %189, %115 : vector<2x32xf32>
    %199 = arith.mulf %183, %191 : vector<2x32xf32>
    %200 = arith.addf %198, %199 : vector<2x32xf32>
    %201 = math.tanh %200 : vector<2x32xf32>
    %202 = arith.mulf %197, %201 : vector<2x32xf32>
    %203 = vector.broadcast %168 : i32 to vector<2x1xi32>
    %204 = arith.cmpi slt, %203, %3 : vector<2x1xi32>
    %cst_54 = arith.constant 0.000000e+00 : f32
    %205 = vector.shape_cast %204 : vector<2x1xi1> to vector<2x1xi1>
    %206 = vector.broadcast %205 : vector<2x1xi1> to vector<2x32xi1>
    %207 = vector.broadcast %cst_54 : f32 to vector<2x32xf32>
    %208 = arith.select %206, %202, %207 : vector<2x32xi1>, vector<2x32xf32>
    %209 = arith.index_cast %167 : i32 to index
    %c0_55 = arith.constant 0 : index
    %c0_56 = arith.constant 0 : index
    %210 = vector.load %arg10[%209, %c0_55, %c0_56] : memref<8x2x32xf32, #tpu.memory_space<vmem>>, vector<1x2x32xf32>
    %211 = vector.shape_cast %210 : vector<1x2x32xf32> to vector<2x32xf32>
    %212 = vector.shape_cast %208 : vector<2x32xf32> to vector<1x2x32xf32>
    tpu.vector_store %arg10[%209, %c0_55, %c0_56], %212 {strides = array<i32>} : memref<8x2x32xf32, #tpu.memory_space<vmem>>, vector<1x2x32xf32>,
    %213 = vector.shape_cast %204 : vector<2x1xi1> to vector<2x1xi1>
    %214 = vector.broadcast %213 : vector<2x1xi1> to vector<2x32xi1>
    %215 = arith.select %214, %202, %112 : vector<2x32xi1>, vector<2x32xf32>
    %216 = vector.shape_cast %204 : vector<2x1xi1> to vector<2x1xi1>
    %217 = vector.broadcast %216 : vector<2x1xi1> to vector<2x32xi1>
    %218 = arith.select %217, %200, %115 : vector<2x32xi1>, vector<2x32xf32>
    %c2_i32 = arith.constant 2 : i32
    %219 = arith.addi %8, %c2_i32 : i32
    %220 = arith.index_cast %c2_i32 : i32 to index
    %c0_57 = arith.constant 0 : index
    %c0_58 = arith.constant 0 : index
    %221 = vector.load %arg2[%220, %c0_57, %c0_58] : memref<8x2x128xbf16, #tpu.memory_space<vmem>>, vector<1x2x128xbf16>
    %222 = vector.shape_cast %221 : vector<1x2x128xbf16> to vector<2x128xbf16>
    %223 = arith.truncf %163 : vector<2x32xf32> to vector<2x32xbf16>
    %cst_59 = arith.constant dense<0.000000e+00> : vector<2x128xf32>
    %224 = tpu.matmul %223, %4, %cst_59 {dimension_numbers = #tpu.dot_dimension_numbers<[1], [0], [0], [1], [0, 0, 1, 1], [], []>} : vector<2x32xbf16>, vector<32x128xbf16>, vector<2x128xf32> -> vector<2x128xf32>
    %225 = arith.extf %222 : vector<2x128xbf16> to vector<2x128xf32>
    %226 = arith.addf %224, %225 : vector<2x128xf32>
    %227 = vector.broadcast %6 : vector<1x128xf32> to vector<2x128xf32>
    %228 = arith.addf %226, %227 : vector<2x128xf32>
    %229 = vector.extract_strided_slice %228 {offsets = [0, 0], sizes = [2, 32], strides = [1, 1]} : vector<2x128xf32> to vector<2x32xf32>
    %230 = arith.negf %229 : vector<2x32xf32>
    %231 = math.exp %230 : vector<2x32xf32>
    %cst_60 = arith.constant 1.000000e+00 : f32
    %232 = vector.broadcast %cst_60 : f32 to vector<2x32xf32>
    %233 = arith.addf %232, %231 : vector<2x32xf32>
    %234 = arith.divf %232, %233 : vector<2x32xf32>
    %235 = vector.extract_strided_slice %228 {offsets = [0, 32], sizes = [2, 32], strides = [1, 1]} : vector<2x128xf32> to vector<2x32xf32>
    %236 = arith.negf %235 : vector<2x32xf32>
    %237 = math.exp %236 : vector<2x32xf32>
    %cst_61 = arith.constant 1.000000e+00 : f32
    %238 = vector.broadcast %cst_61 : f32 to vector<2x32xf32>
    %239 = arith.addf %238, %237 : vector<2x32xf32>
    %240 = arith.divf %238, %239 : vector<2x32xf32>
    %241 = vector.extract_strided_slice %228 {offsets = [0, 64], sizes = [2, 32], strides = [1, 1]} : vector<2x128xf32> to vector<2x32xf32>
    %242 = math.tanh %241 : vector<2x32xf32>
    %243 = vector.extract_strided_slice %228 {offsets = [0, 96], sizes = [2, 32], strides = [1, 1]} : vector<2x128xf32> to vector<2x32xf32>
    %244 = arith.negf %243 : vector<2x32xf32>
    %245 = math.exp %244 : vector<2x32xf32>
    %cst_62 = arith.constant 1.000000e+00 : f32
    %246 = vector.broadcast %cst_62 : f32 to vector<2x32xf32>
    %247 = arith.addf %246, %245 : vector<2x32xf32>
    %248 = arith.divf %246, %247 : vector<2x32xf32>
    %249 = arith.mulf %240, %166 : vector<2x32xf32>
    %250 = arith.mulf %234, %242 : vector<2x32xf32>
    %251 = arith.addf %249, %250 : vector<2x32xf32>
    %252 = math.tanh %251 : vector<2x32xf32>
    %253 = arith.mulf %248, %252 : vector<2x32xf32>
    %254 = vector.broadcast %219 : i32 to vector<2x1xi32>
    %255 = arith.cmpi slt, %254, %3 : vector<2x1xi32>
    %cst_63 = arith.constant 0.000000e+00 : f32
    %256 = vector.shape_cast %255 : vector<2x1xi1> to vector<2x1xi1>
    %257 = vector.broadcast %256 : vector<2x1xi1> to vector<2x32xi1>
    %258 = vector.broadcast %cst_63 : f32 to vector<2x32xf32>
    %259 = arith.select %257, %253, %258 : vector<2x32xi1>, vector<2x32xf32>
    %260 = arith.index_cast %c2_i32 : i32 to index
    %c0_64 = arith.constant 0 : index
    %c0_65 = arith.constant 0 : index
    %261 = vector.load %arg9[%260, %c0_64, %c0_65] : memref<8x2x32xf32, #tpu.memory_space<vmem>>, vector<1x2x32xf32>
    %262 = vector.shape_cast %261 : vector<1x2x32xf32> to vector<2x32xf32>
    %263 = vector.shape_cast %259 : vector<2x32xf32> to vector<1x2x32xf32>
    tpu.vector_store %arg9[%260, %c0_64, %c0_65], %263 {strides = array<i32>} : memref<8x2x32xf32, #tpu.memory_space<vmem>>, vector<1x2x32xf32>,
    %264 = vector.shape_cast %255 : vector<2x1xi1> to vector<2x1xi1>
    %265 = vector.broadcast %264 : vector<2x1xi1> to vector<2x32xi1>
    %266 = arith.select %265, %253, %163 : vector<2x32xi1>, vector<2x32xf32>
    %267 = vector.shape_cast %255 : vector<2x1xi1> to vector<2x1xi1>
    %268 = vector.broadcast %267 : vector<2x1xi1> to vector<2x32xi1>
    %269 = arith.select %268, %251, %166 : vector<2x32xi1>, vector<2x32xf32>
    %c7_i32_66 = arith.constant 7 : i32
    %270 = arith.subi %c7_i32_66, %c2_i32 : i32
    %c7_i32_67 = arith.constant 7 : i32
    %271 = arith.subi %c7_i32_67, %219 : i32
    %272 = arith.index_cast %270 : i32 to index
    %c0_68 = arith.constant 0 : index
    %c0_69 = arith.constant 0 : index
    %273 = vector.load %arg3[%272, %c0_68, %c0_69] : memref<8x2x128xbf16, #tpu.memory_space<vmem>>, vector<1x2x128xbf16>
    %274 = vector.shape_cast %273 : vector<1x2x128xbf16> to vector<2x128xbf16>
    %275 = arith.truncf %215 : vector<2x32xf32> to vector<2x32xbf16>
    %cst_70 = arith.constant dense<0.000000e+00> : vector<2x128xf32>
    %276 = tpu.matmul %275, %5, %cst_70 {dimension_numbers = #tpu.dot_dimension_numbers<[1], [0], [0], [1], [0, 0, 1, 1], [], []>} : vector<2x32xbf16>, vector<32x128xbf16>, vector<2x128xf32> -> vector<2x128xf32>
    %277 = arith.extf %274 : vector<2x128xbf16> to vector<2x128xf32>
    %278 = arith.addf %276, %277 : vector<2x128xf32>
    %279 = vector.broadcast %7 : vector<1x128xf32> to vector<2x128xf32>
    %280 = arith.addf %278, %279 : vector<2x128xf32>
    %281 = vector.extract_strided_slice %280 {offsets = [0, 0], sizes = [2, 32], strides = [1, 1]} : vector<2x128xf32> to vector<2x32xf32>
    %282 = arith.negf %281 : vector<2x32xf32>
    %283 = math.exp %282 : vector<2x32xf32>
    %cst_71 = arith.constant 1.000000e+00 : f32
    %284 = vector.broadcast %cst_71 : f32 to vector<2x32xf32>
    %285 = arith.addf %284, %283 : vector<2x32xf32>
    %286 = arith.divf %284, %285 : vector<2x32xf32>
    %287 = vector.extract_strided_slice %280 {offsets = [0, 32], sizes = [2, 32], strides = [1, 1]} : vector<2x128xf32> to vector<2x32xf32>
    %288 = arith.negf %287 : vector<2x32xf32>
    %289 = math.exp %288 : vector<2x32xf32>
    %cst_72 = arith.constant 1.000000e+00 : f32
    %290 = vector.broadcast %cst_72 : f32 to vector<2x32xf32>
    %291 = arith.addf %290, %289 : vector<2x32xf32>
    %292 = arith.divf %290, %291 : vector<2x32xf32>
    %293 = vector.extract_strided_slice %280 {offsets = [0, 64], sizes = [2, 32], strides = [1, 1]} : vector<2x128xf32> to vector<2x32xf32>
    %294 = math.tanh %293 : vector<2x32xf32>
    %295 = vector.extract_strided_slice %280 {offsets = [0, 96], sizes = [2, 32], strides = [1, 1]} : vector<2x128xf32> to vector<2x32xf32>
    %296 = arith.negf %295 : vector<2x32xf32>
    %297 = math.exp %296 : vector<2x32xf32>
    %cst_73 = arith.constant 1.000000e+00 : f32
    %298 = vector.broadcast %cst_73 : f32 to vector<2x32xf32>
    %299 = arith.addf %298, %297 : vector<2x32xf32>
    %300 = arith.divf %298, %299 : vector<2x32xf32>
    %301 = arith.mulf %292, %218 : vector<2x32xf32>
    %302 = arith.mulf %286, %294 : vector<2x32xf32>
    %303 = arith.addf %301, %302 : vector<2x32xf32>
    %304 = math.tanh %303 : vector<2x32xf32>
    %305 = arith.mulf %300, %304 : vector<2x32xf32>
    %306 = vector.broadcast %271 : i32 to vector<2x1xi32>
    %307 = arith.cmpi slt, %306, %3 : vector<2x1xi32>
    %cst_74 = arith.constant 0.000000e+00 : f32
    %308 = vector.shape_cast %307 : vector<2x1xi1> to vector<2x1xi1>
    %309 = vector.broadcast %308 : vector<2x1xi1> to vector<2x32xi1>
    %310 = vector.broadcast %cst_74 : f32 to vector<2x32xf32>
    %311 = arith.select %309, %305, %310 : vector<2x32xi1>, vector<2x32xf32>
    %312 = arith.index_cast %270 : i32 to index
    %c0_75 = arith.constant 0 : index
    %c0_76 = arith.constant 0 : index
    %313 = vector.load %arg10[%312, %c0_75, %c0_76] : memref<8x2x32xf32, #tpu.memory_space<vmem>>, vector<1x2x32xf32>
    %314 = vector.shape_cast %313 : vector<1x2x32xf32> to vector<2x32xf32>
    %315 = vector.shape_cast %311 : vector<2x32xf32> to vector<1x2x32xf32>
    tpu.vector_store %arg10[%312, %c0_75, %c0_76], %315 {strides = array<i32>} : memref<8x2x32xf32, #tpu.memory_space<vmem>>, vector<1x2x32xf32>,
    %316 = vector.shape_cast %307 : vector<2x1xi1> to vector<2x1xi1>
    %317 = vector.broadcast %316 : vector<2x1xi1> to vector<2x32xi1>
    %318 = arith.select %317, %305, %215 : vector<2x32xi1>, vector<2x32xf32>
    %319 = vector.shape_cast %307 : vector<2x1xi1> to vector<2x1xi1>
    %320 = vector.broadcast %319 : vector<2x1xi1> to vector<2x32xi1>
    %321 = arith.select %320, %303, %218 : vector<2x32xi1>, vector<2x32xf32>
    %c3_i32 = arith.constant 3 : i32
    %322 = arith.addi %8, %c3_i32 : i32
    %323 = arith.index_cast %c3_i32 : i32 to index
    %c0_77 = arith.constant 0 : index
    %c0_78 = arith.constant 0 : index
    %324 = vector.load %arg2[%323, %c0_77, %c0_78] : memref<8x2x128xbf16, #tpu.memory_space<vmem>>, vector<1x2x128xbf16>
    %325 = vector.shape_cast %324 : vector<1x2x128xbf16> to vector<2x128xbf16>
    %326 = arith.truncf %266 : vector<2x32xf32> to vector<2x32xbf16>
    %cst_79 = arith.constant dense<0.000000e+00> : vector<2x128xf32>
    %327 = tpu.matmul %326, %4, %cst_79 {dimension_numbers = #tpu.dot_dimension_numbers<[1], [0], [0], [1], [0, 0, 1, 1], [], []>} : vector<2x32xbf16>, vector<32x128xbf16>, vector<2x128xf32> -> vector<2x128xf32>
    %328 = arith.extf %325 : vector<2x128xbf16> to vector<2x128xf32>
    %329 = arith.addf %327, %328 : vector<2x128xf32>
    %330 = vector.broadcast %6 : vector<1x128xf32> to vector<2x128xf32>
    %331 = arith.addf %329, %330 : vector<2x128xf32>
    %332 = vector.extract_strided_slice %331 {offsets = [0, 0], sizes = [2, 32], strides = [1, 1]} : vector<2x128xf32> to vector<2x32xf32>
    %333 = arith.negf %332 : vector<2x32xf32>
    %334 = math.exp %333 : vector<2x32xf32>
    %cst_80 = arith.constant 1.000000e+00 : f32
    %335 = vector.broadcast %cst_80 : f32 to vector<2x32xf32>
    %336 = arith.addf %335, %334 : vector<2x32xf32>
    %337 = arith.divf %335, %336 : vector<2x32xf32>
    %338 = vector.extract_strided_slice %331 {offsets = [0, 32], sizes = [2, 32], strides = [1, 1]} : vector<2x128xf32> to vector<2x32xf32>
    %339 = arith.negf %338 : vector<2x32xf32>
    %340 = math.exp %339 : vector<2x32xf32>
    %cst_81 = arith.constant 1.000000e+00 : f32
    %341 = vector.broadcast %cst_81 : f32 to vector<2x32xf32>
    %342 = arith.addf %341, %340 : vector<2x32xf32>
    %343 = arith.divf %341, %342 : vector<2x32xf32>
    %344 = vector.extract_strided_slice %331 {offsets = [0, 64], sizes = [2, 32], strides = [1, 1]} : vector<2x128xf32> to vector<2x32xf32>
    %345 = math.tanh %344 : vector<2x32xf32>
    %346 = vector.extract_strided_slice %331 {offsets = [0, 96], sizes = [2, 32], strides = [1, 1]} : vector<2x128xf32> to vector<2x32xf32>
    %347 = arith.negf %346 : vector<2x32xf32>
    %348 = math.exp %347 : vector<2x32xf32>
    %cst_82 = arith.constant 1.000000e+00 : f32
    %349 = vector.broadcast %cst_82 : f32 to vector<2x32xf32>
    %350 = arith.addf %349, %348 : vector<2x32xf32>
    %351 = arith.divf %349, %350 : vector<2x32xf32>
    %352 = arith.mulf %343, %269 : vector<2x32xf32>
    %353 = arith.mulf %337, %345 : vector<2x32xf32>
    %354 = arith.addf %352, %353 : vector<2x32xf32>
    %355 = math.tanh %354 : vector<2x32xf32>
    %356 = arith.mulf %351, %355 : vector<2x32xf32>
    %357 = vector.broadcast %322 : i32 to vector<2x1xi32>
    %358 = arith.cmpi slt, %357, %3 : vector<2x1xi32>
    %cst_83 = arith.constant 0.000000e+00 : f32
    %359 = vector.shape_cast %358 : vector<2x1xi1> to vector<2x1xi1>
    %360 = vector.broadcast %359 : vector<2x1xi1> to vector<2x32xi1>
    %361 = vector.broadcast %cst_83 : f32 to vector<2x32xf32>
    %362 = arith.select %360, %356, %361 : vector<2x32xi1>, vector<2x32xf32>
    %363 = arith.index_cast %c3_i32 : i32 to index
    %c0_84 = arith.constant 0 : index
    %c0_85 = arith.constant 0 : index
    %364 = vector.load %arg9[%363, %c0_84, %c0_85] : memref<8x2x32xf32, #tpu.memory_space<vmem>>, vector<1x2x32xf32>
    %365 = vector.shape_cast %364 : vector<1x2x32xf32> to vector<2x32xf32>
    %366 = vector.shape_cast %362 : vector<2x32xf32> to vector<1x2x32xf32>
    tpu.vector_store %arg9[%363, %c0_84, %c0_85], %366 {strides = array<i32>} : memref<8x2x32xf32, #tpu.memory_space<vmem>>, vector<1x2x32xf32>,
    %367 = vector.shape_cast %358 : vector<2x1xi1> to vector<2x1xi1>
    %368 = vector.broadcast %367 : vector<2x1xi1> to vector<2x32xi1>
    %369 = arith.select %368, %356, %266 : vector<2x32xi1>, vector<2x32xf32>
    %370 = vector.shape_cast %358 : vector<2x1xi1> to vector<2x1xi1>
    %371 = vector.broadcast %370 : vector<2x1xi1> to vector<2x32xi1>
    %372 = arith.select %371, %354, %269 : vector<2x32xi1>, vector<2x32xf32>
    %c7_i32_86 = arith.constant 7 : i32
    %373 = arith.subi %c7_i32_86, %c3_i32 : i32
    %c7_i32_87 = arith.constant 7 : i32
    %374 = arith.subi %c7_i32_87, %322 : i32
    %375 = arith.index_cast %373 : i32 to index
    %c0_88 = arith.constant 0 : index
    %c0_89 = arith.constant 0 : index
    %376 = vector.load %arg3[%375, %c0_88, %c0_89] : memref<8x2x128xbf16, #tpu.memory_space<vmem>>, vector<1x2x128xbf16>
    %377 = vector.shape_cast %376 : vector<1x2x128xbf16> to vector<2x128xbf16>
    %378 = arith.truncf %318 : vector<2x32xf32> to vector<2x32xbf16>
    %cst_90 = arith.constant dense<0.000000e+00> : vector<2x128xf32>
    %379 = tpu.matmul %378, %5, %cst_90 {dimension_numbers = #tpu.dot_dimension_numbers<[1], [0], [0], [1], [0, 0, 1, 1], [], []>} : vector<2x32xbf16>, vector<32x128xbf16>, vector<2x128xf32> -> vector<2x128xf32>
    %380 = arith.extf %377 : vector<2x128xbf16> to vector<2x128xf32>
    %381 = arith.addf %379, %380 : vector<2x128xf32>
    %382 = vector.broadcast %7 : vector<1x128xf32> to vector<2x128xf32>
    %383 = arith.addf %381, %382 : vector<2x128xf32>
    %384 = vector.extract_strided_slice %383 {offsets = [0, 0], sizes = [2, 32], strides = [1, 1]} : vector<2x128xf32> to vector<2x32xf32>
    %385 = arith.negf %384 : vector<2x32xf32>
    %386 = math.exp %385 : vector<2x32xf32>
    %cst_91 = arith.constant 1.000000e+00 : f32
    %387 = vector.broadcast %cst_91 : f32 to vector<2x32xf32>
    %388 = arith.addf %387, %386 : vector<2x32xf32>
    %389 = arith.divf %387, %388 : vector<2x32xf32>
    %390 = vector.extract_strided_slice %383 {offsets = [0, 32], sizes = [2, 32], strides = [1, 1]} : vector<2x128xf32> to vector<2x32xf32>
    %391 = arith.negf %390 : vector<2x32xf32>
    %392 = math.exp %391 : vector<2x32xf32>
    %cst_92 = arith.constant 1.000000e+00 : f32
    %393 = vector.broadcast %cst_92 : f32 to vector<2x32xf32>
    %394 = arith.addf %393, %392 : vector<2x32xf32>
    %395 = arith.divf %393, %394 : vector<2x32xf32>
    %396 = vector.extract_strided_slice %383 {offsets = [0, 64], sizes = [2, 32], strides = [1, 1]} : vector<2x128xf32> to vector<2x32xf32>
    %397 = math.tanh %396 : vector<2x32xf32>
    %398 = vector.extract_strided_slice %383 {offsets = [0, 96], sizes = [2, 32], strides = [1, 1]} : vector<2x128xf32> to vector<2x32xf32>
    %399 = arith.negf %398 : vector<2x32xf32>
    %400 = math.exp %399 : vector<2x32xf32>
    %cst_93 = arith.constant 1.000000e+00 : f32
    %401 = vector.broadcast %cst_93 : f32 to vector<2x32xf32>
    %402 = arith.addf %401, %400 : vector<2x32xf32>
    %403 = arith.divf %401, %402 : vector<2x32xf32>
    %404 = arith.mulf %395, %321 : vector<2x32xf32>
    %405 = arith.mulf %389, %397 : vector<2x32xf32>
    %406 = arith.addf %404, %405 : vector<2x32xf32>
    %407 = math.tanh %406 : vector<2x32xf32>
    %408 = arith.mulf %403, %407 : vector<2x32xf32>
    %409 = vector.broadcast %374 : i32 to vector<2x1xi32>
    %410 = arith.cmpi slt, %409, %3 : vector<2x1xi32>
    %cst_94 = arith.constant 0.000000e+00 : f32
    %411 = vector.shape_cast %410 : vector<2x1xi1> to vector<2x1xi1>
    %412 = vector.broadcast %411 : vector<2x1xi1> to vector<2x32xi1>
    %413 = vector.broadcast %cst_94 : f32 to vector<2x32xf32>
    %414 = arith.select %412, %408, %413 : vector<2x32xi1>, vector<2x32xf32>
    %415 = arith.index_cast %373 : i32 to index
    %c0_95 = arith.constant 0 : index
    %c0_96 = arith.constant 0 : index
    %416 = vector.load %arg10[%415, %c0_95, %c0_96] : memref<8x2x32xf32, #tpu.memory_space<vmem>>, vector<1x2x32xf32>
    %417 = vector.shape_cast %416 : vector<1x2x32xf32> to vector<2x32xf32>
    %418 = vector.shape_cast %414 : vector<2x32xf32> to vector<1x2x32xf32>
    tpu.vector_store %arg10[%415, %c0_95, %c0_96], %418 {strides = array<i32>} : memref<8x2x32xf32, #tpu.memory_space<vmem>>, vector<1x2x32xf32>,
    %419 = vector.shape_cast %410 : vector<2x1xi1> to vector<2x1xi1>
    %420 = vector.broadcast %419 : vector<2x1xi1> to vector<2x32xi1>
    %421 = arith.select %420, %408, %318 : vector<2x32xi1>, vector<2x32xf32>
    %422 = vector.shape_cast %410 : vector<2x1xi1> to vector<2x1xi1>
    %423 = vector.broadcast %422 : vector<2x1xi1> to vector<2x32xi1>
    %424 = arith.select %423, %406, %321 : vector<2x32xi1>, vector<2x32xf32>
    %c4_i32 = arith.constant 4 : i32
    %425 = arith.addi %8, %c4_i32 : i32
    %426 = arith.index_cast %c4_i32 : i32 to index
    %c0_97 = arith.constant 0 : index
    %c0_98 = arith.constant 0 : index
    %427 = vector.load %arg2[%426, %c0_97, %c0_98] : memref<8x2x128xbf16, #tpu.memory_space<vmem>>, vector<1x2x128xbf16>
    %428 = vector.shape_cast %427 : vector<1x2x128xbf16> to vector<2x128xbf16>
    %429 = arith.truncf %369 : vector<2x32xf32> to vector<2x32xbf16>
    %cst_99 = arith.constant dense<0.000000e+00> : vector<2x128xf32>
    %430 = tpu.matmul %429, %4, %cst_99 {dimension_numbers = #tpu.dot_dimension_numbers<[1], [0], [0], [1], [0, 0, 1, 1], [], []>} : vector<2x32xbf16>, vector<32x128xbf16>, vector<2x128xf32> -> vector<2x128xf32>
    %431 = arith.extf %428 : vector<2x128xbf16> to vector<2x128xf32>
    %432 = arith.addf %430, %431 : vector<2x128xf32>
    %433 = vector.broadcast %6 : vector<1x128xf32> to vector<2x128xf32>
    %434 = arith.addf %432, %433 : vector<2x128xf32>
    %435 = vector.extract_strided_slice %434 {offsets = [0, 0], sizes = [2, 32], strides = [1, 1]} : vector<2x128xf32> to vector<2x32xf32>
    %436 = arith.negf %435 : vector<2x32xf32>
    %437 = math.exp %436 : vector<2x32xf32>
    %cst_100 = arith.constant 1.000000e+00 : f32
    %438 = vector.broadcast %cst_100 : f32 to vector<2x32xf32>
    %439 = arith.addf %438, %437 : vector<2x32xf32>
    %440 = arith.divf %438, %439 : vector<2x32xf32>
    %441 = vector.extract_strided_slice %434 {offsets = [0, 32], sizes = [2, 32], strides = [1, 1]} : vector<2x128xf32> to vector<2x32xf32>
    %442 = arith.negf %441 : vector<2x32xf32>
    %443 = math.exp %442 : vector<2x32xf32>
    %cst_101 = arith.constant 1.000000e+00 : f32
    %444 = vector.broadcast %cst_101 : f32 to vector<2x32xf32>
    %445 = arith.addf %444, %443 : vector<2x32xf32>
    %446 = arith.divf %444, %445 : vector<2x32xf32>
    %447 = vector.extract_strided_slice %434 {offsets = [0, 64], sizes = [2, 32], strides = [1, 1]} : vector<2x128xf32> to vector<2x32xf32>
    %448 = math.tanh %447 : vector<2x32xf32>
    %449 = vector.extract_strided_slice %434 {offsets = [0, 96], sizes = [2, 32], strides = [1, 1]} : vector<2x128xf32> to vector<2x32xf32>
    %450 = arith.negf %449 : vector<2x32xf32>
    %451 = math.exp %450 : vector<2x32xf32>
    %cst_102 = arith.constant 1.000000e+00 : f32
    %452 = vector.broadcast %cst_102 : f32 to vector<2x32xf32>
    %453 = arith.addf %452, %451 : vector<2x32xf32>
    %454 = arith.divf %452, %453 : vector<2x32xf32>
    %455 = arith.mulf %446, %372 : vector<2x32xf32>
    %456 = arith.mulf %440, %448 : vector<2x32xf32>
    %457 = arith.addf %455, %456 : vector<2x32xf32>
    %458 = math.tanh %457 : vector<2x32xf32>
    %459 = arith.mulf %454, %458 : vector<2x32xf32>
    %460 = vector.broadcast %425 : i32 to vector<2x1xi32>
    %461 = arith.cmpi slt, %460, %3 : vector<2x1xi32>
    %cst_103 = arith.constant 0.000000e+00 : f32
    %462 = vector.shape_cast %461 : vector<2x1xi1> to vector<2x1xi1>
    %463 = vector.broadcast %462 : vector<2x1xi1> to vector<2x32xi1>
    %464 = vector.broadcast %cst_103 : f32 to vector<2x32xf32>
    %465 = arith.select %463, %459, %464 : vector<2x32xi1>, vector<2x32xf32>
    %466 = arith.index_cast %c4_i32 : i32 to index
    %c0_104 = arith.constant 0 : index
    %c0_105 = arith.constant 0 : index
    %467 = vector.load %arg9[%466, %c0_104, %c0_105] : memref<8x2x32xf32, #tpu.memory_space<vmem>>, vector<1x2x32xf32>
    %468 = vector.shape_cast %467 : vector<1x2x32xf32> to vector<2x32xf32>
    %469 = vector.shape_cast %465 : vector<2x32xf32> to vector<1x2x32xf32>
    tpu.vector_store %arg9[%466, %c0_104, %c0_105], %469 {strides = array<i32>} : memref<8x2x32xf32, #tpu.memory_space<vmem>>, vector<1x2x32xf32>,
    %470 = vector.shape_cast %461 : vector<2x1xi1> to vector<2x1xi1>
    %471 = vector.broadcast %470 : vector<2x1xi1> to vector<2x32xi1>
    %472 = arith.select %471, %459, %369 : vector<2x32xi1>, vector<2x32xf32>
    %473 = vector.shape_cast %461 : vector<2x1xi1> to vector<2x1xi1>
    %474 = vector.broadcast %473 : vector<2x1xi1> to vector<2x32xi1>
    %475 = arith.select %474, %457, %372 : vector<2x32xi1>, vector<2x32xf32>
    %c7_i32_106 = arith.constant 7 : i32
    %476 = arith.subi %c7_i32_106, %c4_i32 : i32
    %c7_i32_107 = arith.constant 7 : i32
    %477 = arith.subi %c7_i32_107, %425 : i32
    %478 = arith.index_cast %476 : i32 to index
    %c0_108 = arith.constant 0 : index
    %c0_109 = arith.constant 0 : index
    %479 = vector.load %arg3[%478, %c0_108, %c0_109] : memref<8x2x128xbf16, #tpu.memory_space<vmem>>, vector<1x2x128xbf16>
    %480 = vector.shape_cast %479 : vector<1x2x128xbf16> to vector<2x128xbf16>
    %481 = arith.truncf %421 : vector<2x32xf32> to vector<2x32xbf16>
    %cst_110 = arith.constant dense<0.000000e+00> : vector<2x128xf32>
    %482 = tpu.matmul %481, %5, %cst_110 {dimension_numbers = #tpu.dot_dimension_numbers<[1], [0], [0], [1], [0, 0, 1, 1], [], []>} : vector<2x32xbf16>, vector<32x128xbf16>, vector<2x128xf32> -> vector<2x128xf32>
    %483 = arith.extf %480 : vector<2x128xbf16> to vector<2x128xf32>
    %484 = arith.addf %482, %483 : vector<2x128xf32>
    %485 = vector.broadcast %7 : vector<1x128xf32> to vector<2x128xf32>
    %486 = arith.addf %484, %485 : vector<2x128xf32>
    %487 = vector.extract_strided_slice %486 {offsets = [0, 0], sizes = [2, 32], strides = [1, 1]} : vector<2x128xf32> to vector<2x32xf32>
    %488 = arith.negf %487 : vector<2x32xf32>
    %489 = math.exp %488 : vector<2x32xf32>
    %cst_111 = arith.constant 1.000000e+00 : f32
    %490 = vector.broadcast %cst_111 : f32 to vector<2x32xf32>
    %491 = arith.addf %490, %489 : vector<2x32xf32>
    %492 = arith.divf %490, %491 : vector<2x32xf32>
    %493 = vector.extract_strided_slice %486 {offsets = [0, 32], sizes = [2, 32], strides = [1, 1]} : vector<2x128xf32> to vector<2x32xf32>
    %494 = arith.negf %493 : vector<2x32xf32>
    %495 = math.exp %494 : vector<2x32xf32>
    %cst_112 = arith.constant 1.000000e+00 : f32
    %496 = vector.broadcast %cst_112 : f32 to vector<2x32xf32>
    %497 = arith.addf %496, %495 : vector<2x32xf32>
    %498 = arith.divf %496, %497 : vector<2x32xf32>
    %499 = vector.extract_strided_slice %486 {offsets = [0, 64], sizes = [2, 32], strides = [1, 1]} : vector<2x128xf32> to vector<2x32xf32>
    %500 = math.tanh %499 : vector<2x32xf32>
    %501 = vector.extract_strided_slice %486 {offsets = [0, 96], sizes = [2, 32], strides = [1, 1]} : vector<2x128xf32> to vector<2x32xf32>
    %502 = arith.negf %501 : vector<2x32xf32>
    %503 = math.exp %502 : vector<2x32xf32>
    %cst_113 = arith.constant 1.000000e+00 : f32
    %504 = vector.broadcast %cst_113 : f32 to vector<2x32xf32>
    %505 = arith.addf %504, %503 : vector<2x32xf32>
    %506 = arith.divf %504, %505 : vector<2x32xf32>
    %507 = arith.mulf %498, %424 : vector<2x32xf32>
    %508 = arith.mulf %492, %500 : vector<2x32xf32>
    %509 = arith.addf %507, %508 : vector<2x32xf32>
    %510 = math.tanh %509 : vector<2x32xf32>
    %511 = arith.mulf %506, %510 : vector<2x32xf32>
    %512 = vector.broadcast %477 : i32 to vector<2x1xi32>
    %513 = arith.cmpi slt, %512, %3 : vector<2x1xi32>
    %cst_114 = arith.constant 0.000000e+00 : f32
    %514 = vector.shape_cast %513 : vector<2x1xi1> to vector<2x1xi1>
    %515 = vector.broadcast %514 : vector<2x1xi1> to vector<2x32xi1>
    %516 = vector.broadcast %cst_114 : f32 to vector<2x32xf32>
    %517 = arith.select %515, %511, %516 : vector<2x32xi1>, vector<2x32xf32>
    %518 = arith.index_cast %476 : i32 to index
    %c0_115 = arith.constant 0 : index
    %c0_116 = arith.constant 0 : index
    %519 = vector.load %arg10[%518, %c0_115, %c0_116] : memref<8x2x32xf32, #tpu.memory_space<vmem>>, vector<1x2x32xf32>
    %520 = vector.shape_cast %519 : vector<1x2x32xf32> to vector<2x32xf32>
    %521 = vector.shape_cast %517 : vector<2x32xf32> to vector<1x2x32xf32>
    tpu.vector_store %arg10[%518, %c0_115, %c0_116], %521 {strides = array<i32>} : memref<8x2x32xf32, #tpu.memory_space<vmem>>, vector<1x2x32xf32>,
    %522 = vector.shape_cast %513 : vector<2x1xi1> to vector<2x1xi1>
    %523 = vector.broadcast %522 : vector<2x1xi1> to vector<2x32xi1>
    %524 = arith.select %523, %511, %421 : vector<2x32xi1>, vector<2x32xf32>
    %525 = vector.shape_cast %513 : vector<2x1xi1> to vector<2x1xi1>
    %526 = vector.broadcast %525 : vector<2x1xi1> to vector<2x32xi1>
    %527 = arith.select %526, %509, %424 : vector<2x32xi1>, vector<2x32xf32>
    %c5_i32 = arith.constant 5 : i32
    %528 = arith.addi %8, %c5_i32 : i32
    %529 = arith.index_cast %c5_i32 : i32 to index
    %c0_117 = arith.constant 0 : index
    %c0_118 = arith.constant 0 : index
    %530 = vector.load %arg2[%529, %c0_117, %c0_118] : memref<8x2x128xbf16, #tpu.memory_space<vmem>>, vector<1x2x128xbf16>
    %531 = vector.shape_cast %530 : vector<1x2x128xbf16> to vector<2x128xbf16>
    %532 = arith.truncf %472 : vector<2x32xf32> to vector<2x32xbf16>
    %cst_119 = arith.constant dense<0.000000e+00> : vector<2x128xf32>
    %533 = tpu.matmul %532, %4, %cst_119 {dimension_numbers = #tpu.dot_dimension_numbers<[1], [0], [0], [1], [0, 0, 1, 1], [], []>} : vector<2x32xbf16>, vector<32x128xbf16>, vector<2x128xf32> -> vector<2x128xf32>
    %534 = arith.extf %531 : vector<2x128xbf16> to vector<2x128xf32>
    %535 = arith.addf %533, %534 : vector<2x128xf32>
    %536 = vector.broadcast %6 : vector<1x128xf32> to vector<2x128xf32>
    %537 = arith.addf %535, %536 : vector<2x128xf32>
    %538 = vector.extract_strided_slice %537 {offsets = [0, 0], sizes = [2, 32], strides = [1, 1]} : vector<2x128xf32> to vector<2x32xf32>
    %539 = arith.negf %538 : vector<2x32xf32>
    %540 = math.exp %539 : vector<2x32xf32>
    %cst_120 = arith.constant 1.000000e+00 : f32
    %541 = vector.broadcast %cst_120 : f32 to vector<2x32xf32>
    %542 = arith.addf %541, %540 : vector<2x32xf32>
    %543 = arith.divf %541, %542 : vector<2x32xf32>
    %544 = vector.extract_strided_slice %537 {offsets = [0, 32], sizes = [2, 32], strides = [1, 1]} : vector<2x128xf32> to vector<2x32xf32>
    %545 = arith.negf %544 : vector<2x32xf32>
    %546 = math.exp %545 : vector<2x32xf32>
    %cst_121 = arith.constant 1.000000e+00 : f32
    %547 = vector.broadcast %cst_121 : f32 to vector<2x32xf32>
    %548 = arith.addf %547, %546 : vector<2x32xf32>
    %549 = arith.divf %547, %548 : vector<2x32xf32>
    %550 = vector.extract_strided_slice %537 {offsets = [0, 64], sizes = [2, 32], strides = [1, 1]} : vector<2x128xf32> to vector<2x32xf32>
    %551 = math.tanh %550 : vector<2x32xf32>
    %552 = vector.extract_strided_slice %537 {offsets = [0, 96], sizes = [2, 32], strides = [1, 1]} : vector<2x128xf32> to vector<2x32xf32>
    %553 = arith.negf %552 : vector<2x32xf32>
    %554 = math.exp %553 : vector<2x32xf32>
    %cst_122 = arith.constant 1.000000e+00 : f32
    %555 = vector.broadcast %cst_122 : f32 to vector<2x32xf32>
    %556 = arith.addf %555, %554 : vector<2x32xf32>
    %557 = arith.divf %555, %556 : vector<2x32xf32>
    %558 = arith.mulf %549, %475 : vector<2x32xf32>
    %559 = arith.mulf %543, %551 : vector<2x32xf32>
    %560 = arith.addf %558, %559 : vector<2x32xf32>
    %561 = math.tanh %560 : vector<2x32xf32>
    %562 = arith.mulf %557, %561 : vector<2x32xf32>
    %563 = vector.broadcast %528 : i32 to vector<2x1xi32>
    %564 = arith.cmpi slt, %563, %3 : vector<2x1xi32>
    %cst_123 = arith.constant 0.000000e+00 : f32
    %565 = vector.shape_cast %564 : vector<2x1xi1> to vector<2x1xi1>
    %566 = vector.broadcast %565 : vector<2x1xi1> to vector<2x32xi1>
    %567 = vector.broadcast %cst_123 : f32 to vector<2x32xf32>
    %568 = arith.select %566, %562, %567 : vector<2x32xi1>, vector<2x32xf32>
    %569 = arith.index_cast %c5_i32 : i32 to index
    %c0_124 = arith.constant 0 : index
    %c0_125 = arith.constant 0 : index
    %570 = vector.load %arg9[%569, %c0_124, %c0_125] : memref<8x2x32xf32, #tpu.memory_space<vmem>>, vector<1x2x32xf32>
    %571 = vector.shape_cast %570 : vector<1x2x32xf32> to vector<2x32xf32>
    %572 = vector.shape_cast %568 : vector<2x32xf32> to vector<1x2x32xf32>
    tpu.vector_store %arg9[%569, %c0_124, %c0_125], %572 {strides = array<i32>} : memref<8x2x32xf32, #tpu.memory_space<vmem>>, vector<1x2x32xf32>,
    %573 = vector.shape_cast %564 : vector<2x1xi1> to vector<2x1xi1>
    %574 = vector.broadcast %573 : vector<2x1xi1> to vector<2x32xi1>
    %575 = arith.select %574, %562, %472 : vector<2x32xi1>, vector<2x32xf32>
    %576 = vector.shape_cast %564 : vector<2x1xi1> to vector<2x1xi1>
    %577 = vector.broadcast %576 : vector<2x1xi1> to vector<2x32xi1>
    %578 = arith.select %577, %560, %475 : vector<2x32xi1>, vector<2x32xf32>
    %c7_i32_126 = arith.constant 7 : i32
    %579 = arith.subi %c7_i32_126, %c5_i32 : i32
    %c7_i32_127 = arith.constant 7 : i32
    %580 = arith.subi %c7_i32_127, %528 : i32
    %581 = arith.index_cast %579 : i32 to index
    %c0_128 = arith.constant 0 : index
    %c0_129 = arith.constant 0 : index
    %582 = vector.load %arg3[%581, %c0_128, %c0_129] : memref<8x2x128xbf16, #tpu.memory_space<vmem>>, vector<1x2x128xbf16>
    %583 = vector.shape_cast %582 : vector<1x2x128xbf16> to vector<2x128xbf16>
    %584 = arith.truncf %524 : vector<2x32xf32> to vector<2x32xbf16>
    %cst_130 = arith.constant dense<0.000000e+00> : vector<2x128xf32>
    %585 = tpu.matmul %584, %5, %cst_130 {dimension_numbers = #tpu.dot_dimension_numbers<[1], [0], [0], [1], [0, 0, 1, 1], [], []>} : vector<2x32xbf16>, vector<32x128xbf16>, vector<2x128xf32> -> vector<2x128xf32>
    %586 = arith.extf %583 : vector<2x128xbf16> to vector<2x128xf32>
    %587 = arith.addf %585, %586 : vector<2x128xf32>
    %588 = vector.broadcast %7 : vector<1x128xf32> to vector<2x128xf32>
    %589 = arith.addf %587, %588 : vector<2x128xf32>
    %590 = vector.extract_strided_slice %589 {offsets = [0, 0], sizes = [2, 32], strides = [1, 1]} : vector<2x128xf32> to vector<2x32xf32>
    %591 = arith.negf %590 : vector<2x32xf32>
    %592 = math.exp %591 : vector<2x32xf32>
    %cst_131 = arith.constant 1.000000e+00 : f32
    %593 = vector.broadcast %cst_131 : f32 to vector<2x32xf32>
    %594 = arith.addf %593, %592 : vector<2x32xf32>
    %595 = arith.divf %593, %594 : vector<2x32xf32>
    %596 = vector.extract_strided_slice %589 {offsets = [0, 32], sizes = [2, 32], strides = [1, 1]} : vector<2x128xf32> to vector<2x32xf32>
    %597 = arith.negf %596 : vector<2x32xf32>
    %598 = math.exp %597 : vector<2x32xf32>
    %cst_132 = arith.constant 1.000000e+00 : f32
    %599 = vector.broadcast %cst_132 : f32 to vector<2x32xf32>
    %600 = arith.addf %599, %598 : vector<2x32xf32>
    %601 = arith.divf %599, %600 : vector<2x32xf32>
    %602 = vector.extract_strided_slice %589 {offsets = [0, 64], sizes = [2, 32], strides = [1, 1]} : vector<2x128xf32> to vector<2x32xf32>
    %603 = math.tanh %602 : vector<2x32xf32>
    %604 = vector.extract_strided_slice %589 {offsets = [0, 96], sizes = [2, 32], strides = [1, 1]} : vector<2x128xf32> to vector<2x32xf32>
    %605 = arith.negf %604 : vector<2x32xf32>
    %606 = math.exp %605 : vector<2x32xf32>
    %cst_133 = arith.constant 1.000000e+00 : f32
    %607 = vector.broadcast %cst_133 : f32 to vector<2x32xf32>
    %608 = arith.addf %607, %606 : vector<2x32xf32>
    %609 = arith.divf %607, %608 : vector<2x32xf32>
    %610 = arith.mulf %601, %527 : vector<2x32xf32>
    %611 = arith.mulf %595, %603 : vector<2x32xf32>
    %612 = arith.addf %610, %611 : vector<2x32xf32>
    %613 = math.tanh %612 : vector<2x32xf32>
    %614 = arith.mulf %609, %613 : vector<2x32xf32>
    %615 = vector.broadcast %580 : i32 to vector<2x1xi32>
    %616 = arith.cmpi slt, %615, %3 : vector<2x1xi32>
    %cst_134 = arith.constant 0.000000e+00 : f32
    %617 = vector.shape_cast %616 : vector<2x1xi1> to vector<2x1xi1>
    %618 = vector.broadcast %617 : vector<2x1xi1> to vector<2x32xi1>
    %619 = vector.broadcast %cst_134 : f32 to vector<2x32xf32>
    %620 = arith.select %618, %614, %619 : vector<2x32xi1>, vector<2x32xf32>
    %621 = arith.index_cast %579 : i32 to index
    %c0_135 = arith.constant 0 : index
    %c0_136 = arith.constant 0 : index
    %622 = vector.load %arg10[%621, %c0_135, %c0_136] : memref<8x2x32xf32, #tpu.memory_space<vmem>>, vector<1x2x32xf32>
    %623 = vector.shape_cast %622 : vector<1x2x32xf32> to vector<2x32xf32>
    %624 = vector.shape_cast %620 : vector<2x32xf32> to vector<1x2x32xf32>
    tpu.vector_store %arg10[%621, %c0_135, %c0_136], %624 {strides = array<i32>} : memref<8x2x32xf32, #tpu.memory_space<vmem>>, vector<1x2x32xf32>,
    %625 = vector.shape_cast %616 : vector<2x1xi1> to vector<2x1xi1>
    %626 = vector.broadcast %625 : vector<2x1xi1> to vector<2x32xi1>
    %627 = arith.select %626, %614, %524 : vector<2x32xi1>, vector<2x32xf32>
    %628 = vector.shape_cast %616 : vector<2x1xi1> to vector<2x1xi1>
    %629 = vector.broadcast %628 : vector<2x1xi1> to vector<2x32xi1>
    %630 = arith.select %629, %612, %527 : vector<2x32xi1>, vector<2x32xf32>
    %c6_i32 = arith.constant 6 : i32
    %631 = arith.addi %8, %c6_i32 : i32
    %632 = arith.index_cast %c6_i32 : i32 to index
    %c0_137 = arith.constant 0 : index
    %c0_138 = arith.constant 0 : index
    %633 = vector.load %arg2[%632, %c0_137, %c0_138] : memref<8x2x128xbf16, #tpu.memory_space<vmem>>, vector<1x2x128xbf16>
    %634 = vector.shape_cast %633 : vector<1x2x128xbf16> to vector<2x128xbf16>
    %635 = arith.truncf %575 : vector<2x32xf32> to vector<2x32xbf16>
    %cst_139 = arith.constant dense<0.000000e+00> : vector<2x128xf32>
    %636 = tpu.matmul %635, %4, %cst_139 {dimension_numbers = #tpu.dot_dimension_numbers<[1], [0], [0], [1], [0, 0, 1, 1], [], []>} : vector<2x32xbf16>, vector<32x128xbf16>, vector<2x128xf32> -> vector<2x128xf32>
    %637 = arith.extf %634 : vector<2x128xbf16> to vector<2x128xf32>
    %638 = arith.addf %636, %637 : vector<2x128xf32>
    %639 = vector.broadcast %6 : vector<1x128xf32> to vector<2x128xf32>
    %640 = arith.addf %638, %639 : vector<2x128xf32>
    %641 = vector.extract_strided_slice %640 {offsets = [0, 0], sizes = [2, 32], strides = [1, 1]} : vector<2x128xf32> to vector<2x32xf32>
    %642 = arith.negf %641 : vector<2x32xf32>
    %643 = math.exp %642 : vector<2x32xf32>
    %cst_140 = arith.constant 1.000000e+00 : f32
    %644 = vector.broadcast %cst_140 : f32 to vector<2x32xf32>
    %645 = arith.addf %644, %643 : vector<2x32xf32>
    %646 = arith.divf %644, %645 : vector<2x32xf32>
    %647 = vector.extract_strided_slice %640 {offsets = [0, 32], sizes = [2, 32], strides = [1, 1]} : vector<2x128xf32> to vector<2x32xf32>
    %648 = arith.negf %647 : vector<2x32xf32>
    %649 = math.exp %648 : vector<2x32xf32>
    %cst_141 = arith.constant 1.000000e+00 : f32
    %650 = vector.broadcast %cst_141 : f32 to vector<2x32xf32>
    %651 = arith.addf %650, %649 : vector<2x32xf32>
    %652 = arith.divf %650, %651 : vector<2x32xf32>
    %653 = vector.extract_strided_slice %640 {offsets = [0, 64], sizes = [2, 32], strides = [1, 1]} : vector<2x128xf32> to vector<2x32xf32>
    %654 = math.tanh %653 : vector<2x32xf32>
    %655 = vector.extract_strided_slice %640 {offsets = [0, 96], sizes = [2, 32], strides = [1, 1]} : vector<2x128xf32> to vector<2x32xf32>
    %656 = arith.negf %655 : vector<2x32xf32>
    %657 = math.exp %656 : vector<2x32xf32>
    %cst_142 = arith.constant 1.000000e+00 : f32
    %658 = vector.broadcast %cst_142 : f32 to vector<2x32xf32>
    %659 = arith.addf %658, %657 : vector<2x32xf32>
    %660 = arith.divf %658, %659 : vector<2x32xf32>
    %661 = arith.mulf %652, %578 : vector<2x32xf32>
    %662 = arith.mulf %646, %654 : vector<2x32xf32>
    %663 = arith.addf %661, %662 : vector<2x32xf32>
    %664 = math.tanh %663 : vector<2x32xf32>
    %665 = arith.mulf %660, %664 : vector<2x32xf32>
    %666 = vector.broadcast %631 : i32 to vector<2x1xi32>
    %667 = arith.cmpi slt, %666, %3 : vector<2x1xi32>
    %cst_143 = arith.constant 0.000000e+00 : f32
    %668 = vector.shape_cast %667 : vector<2x1xi1> to vector<2x1xi1>
    %669 = vector.broadcast %668 : vector<2x1xi1> to vector<2x32xi1>
    %670 = vector.broadcast %cst_143 : f32 to vector<2x32xf32>
    %671 = arith.select %669, %665, %670 : vector<2x32xi1>, vector<2x32xf32>
    %672 = arith.index_cast %c6_i32 : i32 to index
    %c0_144 = arith.constant 0 : index
    %c0_145 = arith.constant 0 : index
    %673 = vector.load %arg9[%672, %c0_144, %c0_145] : memref<8x2x32xf32, #tpu.memory_space<vmem>>, vector<1x2x32xf32>
    %674 = vector.shape_cast %673 : vector<1x2x32xf32> to vector<2x32xf32>
    %675 = vector.shape_cast %671 : vector<2x32xf32> to vector<1x2x32xf32>
    tpu.vector_store %arg9[%672, %c0_144, %c0_145], %675 {strides = array<i32>} : memref<8x2x32xf32, #tpu.memory_space<vmem>>, vector<1x2x32xf32>,
    %676 = vector.shape_cast %667 : vector<2x1xi1> to vector<2x1xi1>
    %677 = vector.broadcast %676 : vector<2x1xi1> to vector<2x32xi1>
    %678 = arith.select %677, %665, %575 : vector<2x32xi1>, vector<2x32xf32>
    %679 = vector.shape_cast %667 : vector<2x1xi1> to vector<2x1xi1>
    %680 = vector.broadcast %679 : vector<2x1xi1> to vector<2x32xi1>
    %681 = arith.select %680, %663, %578 : vector<2x32xi1>, vector<2x32xf32>
    %c7_i32_146 = arith.constant 7 : i32
    %682 = arith.subi %c7_i32_146, %c6_i32 : i32
    %c7_i32_147 = arith.constant 7 : i32
    %683 = arith.subi %c7_i32_147, %631 : i32
    %684 = arith.index_cast %682 : i32 to index
    %c0_148 = arith.constant 0 : index
    %c0_149 = arith.constant 0 : index
    %685 = vector.load %arg3[%684, %c0_148, %c0_149] : memref<8x2x128xbf16, #tpu.memory_space<vmem>>, vector<1x2x128xbf16>
    %686 = vector.shape_cast %685 : vector<1x2x128xbf16> to vector<2x128xbf16>
    %687 = arith.truncf %627 : vector<2x32xf32> to vector<2x32xbf16>
    %cst_150 = arith.constant dense<0.000000e+00> : vector<2x128xf32>
    %688 = tpu.matmul %687, %5, %cst_150 {dimension_numbers = #tpu.dot_dimension_numbers<[1], [0], [0], [1], [0, 0, 1, 1], [], []>} : vector<2x32xbf16>, vector<32x128xbf16>, vector<2x128xf32> -> vector<2x128xf32>
    %689 = arith.extf %686 : vector<2x128xbf16> to vector<2x128xf32>
    %690 = arith.addf %688, %689 : vector<2x128xf32>
    %691 = vector.broadcast %7 : vector<1x128xf32> to vector<2x128xf32>
    %692 = arith.addf %690, %691 : vector<2x128xf32>
    %693 = vector.extract_strided_slice %692 {offsets = [0, 0], sizes = [2, 32], strides = [1, 1]} : vector<2x128xf32> to vector<2x32xf32>
    %694 = arith.negf %693 : vector<2x32xf32>
    %695 = math.exp %694 : vector<2x32xf32>
    %cst_151 = arith.constant 1.000000e+00 : f32
    %696 = vector.broadcast %cst_151 : f32 to vector<2x32xf32>
    %697 = arith.addf %696, %695 : vector<2x32xf32>
    %698 = arith.divf %696, %697 : vector<2x32xf32>
    %699 = vector.extract_strided_slice %692 {offsets = [0, 32], sizes = [2, 32], strides = [1, 1]} : vector<2x128xf32> to vector<2x32xf32>
    %700 = arith.negf %699 : vector<2x32xf32>
    %701 = math.exp %700 : vector<2x32xf32>
    %cst_152 = arith.constant 1.000000e+00 : f32
    %702 = vector.broadcast %cst_152 : f32 to vector<2x32xf32>
    %703 = arith.addf %702, %701 : vector<2x32xf32>
    %704 = arith.divf %702, %703 : vector<2x32xf32>
    %705 = vector.extract_strided_slice %692 {offsets = [0, 64], sizes = [2, 32], strides = [1, 1]} : vector<2x128xf32> to vector<2x32xf32>
    %706 = math.tanh %705 : vector<2x32xf32>
    %707 = vector.extract_strided_slice %692 {offsets = [0, 96], sizes = [2, 32], strides = [1, 1]} : vector<2x128xf32> to vector<2x32xf32>
    %708 = arith.negf %707 : vector<2x32xf32>
    %709 = math.exp %708 : vector<2x32xf32>
    %cst_153 = arith.constant 1.000000e+00 : f32
    %710 = vector.broadcast %cst_153 : f32 to vector<2x32xf32>
    %711 = arith.addf %710, %709 : vector<2x32xf32>
    %712 = arith.divf %710, %711 : vector<2x32xf32>
    %713 = arith.mulf %704, %630 : vector<2x32xf32>
    %714 = arith.mulf %698, %706 : vector<2x32xf32>
    %715 = arith.addf %713, %714 : vector<2x32xf32>
    %716 = math.tanh %715 : vector<2x32xf32>
    %717 = arith.mulf %712, %716 : vector<2x32xf32>
    %718 = vector.broadcast %683 : i32 to vector<2x1xi32>
    %719 = arith.cmpi slt, %718, %3 : vector<2x1xi32>
    %cst_154 = arith.constant 0.000000e+00 : f32
    %720 = vector.shape_cast %719 : vector<2x1xi1> to vector<2x1xi1>
    %721 = vector.broadcast %720 : vector<2x1xi1> to vector<2x32xi1>
    %722 = vector.broadcast %cst_154 : f32 to vector<2x32xf32>
    %723 = arith.select %721, %717, %722 : vector<2x32xi1>, vector<2x32xf32>
    %724 = arith.index_cast %682 : i32 to index
    %c0_155 = arith.constant 0 : index
    %c0_156 = arith.constant 0 : index
    %725 = vector.load %arg10[%724, %c0_155, %c0_156] : memref<8x2x32xf32, #tpu.memory_space<vmem>>, vector<1x2x32xf32>
    %726 = vector.shape_cast %725 : vector<1x2x32xf32> to vector<2x32xf32>
    %727 = vector.shape_cast %723 : vector<2x32xf32> to vector<1x2x32xf32>
    tpu.vector_store %arg10[%724, %c0_155, %c0_156], %727 {strides = array<i32>} : memref<8x2x32xf32, #tpu.memory_space<vmem>>, vector<1x2x32xf32>,
    %728 = vector.shape_cast %719 : vector<2x1xi1> to vector<2x1xi1>
    %729 = vector.broadcast %728 : vector<2x1xi1> to vector<2x32xi1>
    %730 = arith.select %729, %717, %627 : vector<2x32xi1>, vector<2x32xf32>
    %731 = vector.shape_cast %719 : vector<2x1xi1> to vector<2x1xi1>
    %732 = vector.broadcast %731 : vector<2x1xi1> to vector<2x32xi1>
    %733 = arith.select %732, %715, %630 : vector<2x32xi1>, vector<2x32xf32>
    %c7_i32_157 = arith.constant 7 : i32
    %734 = arith.addi %8, %c7_i32_157 : i32
    %735 = arith.index_cast %c7_i32_157 : i32 to index
    %c0_158 = arith.constant 0 : index
    %c0_159 = arith.constant 0 : index
    %736 = vector.load %arg2[%735, %c0_158, %c0_159] : memref<8x2x128xbf16, #tpu.memory_space<vmem>>, vector<1x2x128xbf16>
    %737 = vector.shape_cast %736 : vector<1x2x128xbf16> to vector<2x128xbf16>
    %738 = arith.truncf %678 : vector<2x32xf32> to vector<2x32xbf16>
    %cst_160 = arith.constant dense<0.000000e+00> : vector<2x128xf32>
    %739 = tpu.matmul %738, %4, %cst_160 {dimension_numbers = #tpu.dot_dimension_numbers<[1], [0], [0], [1], [0, 0, 1, 1], [], []>} : vector<2x32xbf16>, vector<32x128xbf16>, vector<2x128xf32> -> vector<2x128xf32>
    %740 = arith.extf %737 : vector<2x128xbf16> to vector<2x128xf32>
    %741 = arith.addf %739, %740 : vector<2x128xf32>
    %742 = vector.broadcast %6 : vector<1x128xf32> to vector<2x128xf32>
    %743 = arith.addf %741, %742 : vector<2x128xf32>
    %744 = vector.extract_strided_slice %743 {offsets = [0, 0], sizes = [2, 32], strides = [1, 1]} : vector<2x128xf32> to vector<2x32xf32>
    %745 = arith.negf %744 : vector<2x32xf32>
    %746 = math.exp %745 : vector<2x32xf32>
    %cst_161 = arith.constant 1.000000e+00 : f32
    %747 = vector.broadcast %cst_161 : f32 to vector<2x32xf32>
    %748 = arith.addf %747, %746 : vector<2x32xf32>
    %749 = arith.divf %747, %748 : vector<2x32xf32>
    %750 = vector.extract_strided_slice %743 {offsets = [0, 32], sizes = [2, 32], strides = [1, 1]} : vector<2x128xf32> to vector<2x32xf32>
    %751 = arith.negf %750 : vector<2x32xf32>
    %752 = math.exp %751 : vector<2x32xf32>
    %cst_162 = arith.constant 1.000000e+00 : f32
    %753 = vector.broadcast %cst_162 : f32 to vector<2x32xf32>
    %754 = arith.addf %753, %752 : vector<2x32xf32>
    %755 = arith.divf %753, %754 : vector<2x32xf32>
    %756 = vector.extract_strided_slice %743 {offsets = [0, 64], sizes = [2, 32], strides = [1, 1]} : vector<2x128xf32> to vector<2x32xf32>
    %757 = math.tanh %756 : vector<2x32xf32>
    %758 = vector.extract_strided_slice %743 {offsets = [0, 96], sizes = [2, 32], strides = [1, 1]} : vector<2x128xf32> to vector<2x32xf32>
    %759 = arith.negf %758 : vector<2x32xf32>
    %760 = math.exp %759 : vector<2x32xf32>
    %cst_163 = arith.constant 1.000000e+00 : f32
    %761 = vector.broadcast %cst_163 : f32 to vector<2x32xf32>
    %762 = arith.addf %761, %760 : vector<2x32xf32>
    %763 = arith.divf %761, %762 : vector<2x32xf32>
    %764 = arith.mulf %755, %681 : vector<2x32xf32>
    %765 = arith.mulf %749, %757 : vector<2x32xf32>
    %766 = arith.addf %764, %765 : vector<2x32xf32>
    %767 = math.tanh %766 : vector<2x32xf32>
    %768 = arith.mulf %763, %767 : vector<2x32xf32>
    %769 = vector.broadcast %734 : i32 to vector<2x1xi32>
    %770 = arith.cmpi slt, %769, %3 : vector<2x1xi32>
    %cst_164 = arith.constant 0.000000e+00 : f32
    %771 = vector.shape_cast %770 : vector<2x1xi1> to vector<2x1xi1>
    %772 = vector.broadcast %771 : vector<2x1xi1> to vector<2x32xi1>
    %773 = vector.broadcast %cst_164 : f32 to vector<2x32xf32>
    %774 = arith.select %772, %768, %773 : vector<2x32xi1>, vector<2x32xf32>
    %775 = arith.index_cast %c7_i32_157 : i32 to index
    %c0_165 = arith.constant 0 : index
    %c0_166 = arith.constant 0 : index
    %776 = vector.load %arg9[%775, %c0_165, %c0_166] : memref<8x2x32xf32, #tpu.memory_space<vmem>>, vector<1x2x32xf32>
    %777 = vector.shape_cast %776 : vector<1x2x32xf32> to vector<2x32xf32>
    %778 = vector.shape_cast %774 : vector<2x32xf32> to vector<1x2x32xf32>
    tpu.vector_store %arg9[%775, %c0_165, %c0_166], %778 {strides = array<i32>} : memref<8x2x32xf32, #tpu.memory_space<vmem>>, vector<1x2x32xf32>,
    %779 = vector.shape_cast %770 : vector<2x1xi1> to vector<2x1xi1>
    %780 = vector.broadcast %779 : vector<2x1xi1> to vector<2x32xi1>
    %781 = arith.select %780, %768, %678 : vector<2x32xi1>, vector<2x32xf32>
    %782 = vector.shape_cast %770 : vector<2x1xi1> to vector<2x1xi1>
    %783 = vector.broadcast %782 : vector<2x1xi1> to vector<2x32xi1>
    %784 = arith.select %783, %766, %681 : vector<2x32xi1>, vector<2x32xf32>
    %c7_i32_167 = arith.constant 7 : i32
    %785 = arith.subi %c7_i32_167, %c7_i32_157 : i32
    %c7_i32_168 = arith.constant 7 : i32
    %786 = arith.subi %c7_i32_168, %734 : i32
    %787 = arith.index_cast %785 : i32 to index
    %c0_169 = arith.constant 0 : index
    %c0_170 = arith.constant 0 : index
    %788 = vector.load %arg3[%787, %c0_169, %c0_170] : memref<8x2x128xbf16, #tpu.memory_space<vmem>>, vector<1x2x128xbf16>
    %789 = vector.shape_cast %788 : vector<1x2x128xbf16> to vector<2x128xbf16>
    %790 = arith.truncf %730 : vector<2x32xf32> to vector<2x32xbf16>
    %cst_171 = arith.constant dense<0.000000e+00> : vector<2x128xf32>
    %791 = tpu.matmul %790, %5, %cst_171 {dimension_numbers = #tpu.dot_dimension_numbers<[1], [0], [0], [1], [0, 0, 1, 1], [], []>} : vector<2x32xbf16>, vector<32x128xbf16>, vector<2x128xf32> -> vector<2x128xf32>
    %792 = arith.extf %789 : vector<2x128xbf16> to vector<2x128xf32>
    %793 = arith.addf %791, %792 : vector<2x128xf32>
    %794 = vector.broadcast %7 : vector<1x128xf32> to vector<2x128xf32>
    %795 = arith.addf %793, %794 : vector<2x128xf32>
    %796 = vector.extract_strided_slice %795 {offsets = [0, 0], sizes = [2, 32], strides = [1, 1]} : vector<2x128xf32> to vector<2x32xf32>
    %797 = arith.negf %796 : vector<2x32xf32>
    %798 = math.exp %797 : vector<2x32xf32>
    %cst_172 = arith.constant 1.000000e+00 : f32
    %799 = vector.broadcast %cst_172 : f32 to vector<2x32xf32>
    %800 = arith.addf %799, %798 : vector<2x32xf32>
    %801 = arith.divf %799, %800 : vector<2x32xf32>
    %802 = vector.extract_strided_slice %795 {offsets = [0, 32], sizes = [2, 32], strides = [1, 1]} : vector<2x128xf32> to vector<2x32xf32>
    %803 = arith.negf %802 : vector<2x32xf32>
    %804 = math.exp %803 : vector<2x32xf32>
    %cst_173 = arith.constant 1.000000e+00 : f32
    %805 = vector.broadcast %cst_173 : f32 to vector<2x32xf32>
    %806 = arith.addf %805, %804 : vector<2x32xf32>
    %807 = arith.divf %805, %806 : vector<2x32xf32>
    %808 = vector.extract_strided_slice %795 {offsets = [0, 64], sizes = [2, 32], strides = [1, 1]} : vector<2x128xf32> to vector<2x32xf32>
    %809 = math.tanh %808 : vector<2x32xf32>
    %810 = vector.extract_strided_slice %795 {offsets = [0, 96], sizes = [2, 32], strides = [1, 1]} : vector<2x128xf32> to vector<2x32xf32>
    %811 = arith.negf %810 : vector<2x32xf32>
    %812 = math.exp %811 : vector<2x32xf32>
    %cst_174 = arith.constant 1.000000e+00 : f32
    %813 = vector.broadcast %cst_174 : f32 to vector<2x32xf32>
    %814 = arith.addf %813, %812 : vector<2x32xf32>
    %815 = arith.divf %813, %814 : vector<2x32xf32>
    %816 = arith.mulf %807, %733 : vector<2x32xf32>
    %817 = arith.mulf %801, %809 : vector<2x32xf32>
    %818 = arith.addf %816, %817 : vector<2x32xf32>
    %819 = math.tanh %818 : vector<2x32xf32>
    %820 = arith.mulf %815, %819 : vector<2x32xf32>
    %821 = vector.broadcast %786 : i32 to vector<2x1xi32>
    %822 = arith.cmpi slt, %821, %3 : vector<2x1xi32>
    %cst_175 = arith.constant 0.000000e+00 : f32
    %823 = vector.shape_cast %822 : vector<2x1xi1> to vector<2x1xi1>
    %824 = vector.broadcast %823 : vector<2x1xi1> to vector<2x32xi1>
    %825 = vector.broadcast %cst_175 : f32 to vector<2x32xf32>
    %826 = arith.select %824, %820, %825 : vector<2x32xi1>, vector<2x32xf32>
    %827 = arith.index_cast %785 : i32 to index
    %c0_176 = arith.constant 0 : index
    %c0_177 = arith.constant 0 : index
    %828 = vector.load %arg10[%827, %c0_176, %c0_177] : memref<8x2x32xf32, #tpu.memory_space<vmem>>, vector<1x2x32xf32>
    %829 = vector.shape_cast %828 : vector<1x2x32xf32> to vector<2x32xf32>
    %830 = vector.shape_cast %826 : vector<2x32xf32> to vector<1x2x32xf32>
    tpu.vector_store %arg10[%827, %c0_176, %c0_177], %830 {strides = array<i32>} : memref<8x2x32xf32, #tpu.memory_space<vmem>>, vector<1x2x32xf32>,
    %831 = vector.shape_cast %822 : vector<2x1xi1> to vector<2x1xi1>
    %832 = vector.broadcast %831 : vector<2x1xi1> to vector<2x32xi1>
    %833 = arith.select %832, %820, %730 : vector<2x32xi1>, vector<2x32xf32>
    %834 = vector.shape_cast %822 : vector<2x1xi1> to vector<2x1xi1>
    %835 = vector.broadcast %834 : vector<2x1xi1> to vector<2x32xi1>
    %836 = arith.select %835, %818, %733 : vector<2x32xi1>, vector<2x32xf32>
    %c8_i32_178 = arith.constant 8 : i32
    %c0_179 = arith.constant 0 : index
    %c0_180 = arith.constant 0 : index
    %837 = vector.load %arg11[%c0_179, %c0_180] : memref<2x32xf32, #tpu.memory_space<vmem>>, vector<2x32xf32>
    tpu.vector_store %arg11[%c0_179, %c0_180], %781 {strides = array<i32>} : memref<2x32xf32, #tpu.memory_space<vmem>>, vector<2x32xf32>,
    %c0_181 = arith.constant 0 : index
    %c0_182 = arith.constant 0 : index
    %838 = vector.load %arg12[%c0_181, %c0_182] : memref<2x32xf32, #tpu.memory_space<vmem>>, vector<2x32xf32>
    tpu.vector_store %arg12[%c0_181, %c0_182], %784 {strides = array<i32>} : memref<2x32xf32, #tpu.memory_space<vmem>>, vector<2x32xf32>,
    %c0_183 = arith.constant 0 : index
    %c0_184 = arith.constant 0 : index
    %839 = vector.load %arg13[%c0_183, %c0_184] : memref<2x32xf32, #tpu.memory_space<vmem>>, vector<2x32xf32>
    tpu.vector_store %arg13[%c0_183, %c0_184], %833 {strides = array<i32>} : memref<2x32xf32, #tpu.memory_space<vmem>>, vector<2x32xf32>,
    %c0_185 = arith.constant 0 : index
    %c0_186 = arith.constant 0 : index
    %840 = vector.load %arg14[%c0_185, %c0_186] : memref<2x32xf32, #tpu.memory_space<vmem>>, vector<2x32xf32>
    tpu.vector_store %arg14[%c0_185, %c0_186], %836 {strides = array<i32>} : memref<2x32xf32, #tpu.memory_space<vmem>>, vector<2x32xf32>,
    return
  }
  func.func @transform_0(%arg0: i32, %arg1: i32) -> (i32, i32, i32) {
    %c0_i32 = arith.constant 0 : i32
    %c0_i32_0 = arith.constant 0 : i32
    return %arg1, %arg0, %c0_i32 : i32, i32, i32
  }
  func.func @transform_1(%arg0: i32, %arg1: i32) -> (i32, i32, i32) {
    %c0_i32 = arith.constant 0 : i32
    %0 = arith.subi %c0_i32, %arg1 : i32
    %c0_i32_0 = arith.constant 0 : i32
    %c0_i32_1 = arith.constant 0 : i32
    return %0, %arg0, %c0_i32_0 : i32, i32, i32
  }
  func.func @transform_2(%arg0: i32, %arg1: i32) -> (i32, i32) {
    %c0_i32 = arith.constant 0 : i32
    %c0_i32_0 = arith.constant 0 : i32
    return %arg0, %c0_i32 : i32, i32
  }
  func.func @transform_3(%arg0: i32, %arg1: i32) -> (i32, i32) {
    %c0_i32 = arith.constant 0 : i32
    %c0_i32_0 = arith.constant 0 : i32
    %c0_i32_1 = arith.constant 0 : i32
    return %c0_i32, %c0_i32_0 : i32, i32
  }
  func.func @transform_4(%arg0: i32, %arg1: i32) -> (i32, i32) {
    %c0_i32 = arith.constant 0 : i32
    %c0_i32_0 = arith.constant 0 : i32
    %c0_i32_1 = arith.constant 0 : i32
    return %c0_i32, %c0_i32_0 : i32, i32
  }
  func.func @transform_5(%arg0: i32, %arg1: i32) -> (i32, i32) {
    %c0_i32 = arith.constant 0 : i32
    %c0_i32_0 = arith.constant 0 : i32
    %c0_i32_1 = arith.constant 0 : i32
    return %c0_i32, %c0_i32_0 : i32, i32
  }
  func.func @transform_6(%arg0: i32, %arg1: i32) -> (i32, i32) {
    %c0_i32 = arith.constant 0 : i32
    %c0_i32_0 = arith.constant 0 : i32
    %c0_i32_1 = arith.constant 0 : i32
    return %c0_i32, %c0_i32_0 : i32, i32
  }
  func.func @transform_7(%arg0: i32, %arg1: i32) -> (i32, i32, i32) {
    %c0_i32 = arith.constant 0 : i32
    %c0_i32_0 = arith.constant 0 : i32
    return %arg1, %arg0, %c0_i32 : i32, i32, i32
  }
  func.func @transform_8(%arg0: i32, %arg1: i32) -> (i32, i32, i32) {
    %c0_i32 = arith.constant 0 : i32
    %0 = arith.subi %c0_i32, %arg1 : i32
    %c0_i32_0 = arith.constant 0 : i32
    %c0_i32_1 = arith.constant 0 : i32
    return %0, %arg0, %c0_i32_0 : i32, i32, i32
  }
}

</mosaic_0001>

<bundles_post_ra>
// kernel: tpu_custom_call.1
= control target key start
LH: loop header
LB: loop body
LE: loop exit
PB: predicated region body
PF: predicated region fallthrough
CT: control target
= control target key end

     0   :  { %14 = vsyncpa [#allocation7], 0  ;;  %s3025_s0 = inlined_call_operand.hbm [shape: bf16[8,2,128], index: 0, kind: input, shape index: {}]   ;;  %s3026_s1 = inlined_call_operand.hbm [shape: bf16[8,2,128], index: 1, kind: input, shape index: {}]   ;;  %s3027_s2 = inlined_call_operand.vmem [shape: s32[2,1], index: 2, kind: input, shape index: {}]   ;;  %s3028_s3 = inlined_call_operand.vmem [shape: f32[1,128], index: 3, kind: input, shape index: {}]   ;;  %s3029_s4 = inlined_call_operand.vmem [shape: f32[1,128], index: 4, kind: input, shape index: {}]   ;;  %s3030_s5 = inlined_call_operand.vmem [shape: bf16[32,128], index: 5, kind: input, shape index: {}]   ;;  %s3031_s6 = inlined_call_operand.hbm [shape: bf16[32,128], index: 6, kind: input, shape index: {}]   ;;  %s3032_s7 = inlined_call_operand.hbm [shape: f32[8,2,32], index: 7, kind: output, shape index: {0}]   ;;  %s3033_s8 = inlined_call_operand.hbm [shape: f32[8,2,32], index: 8, kind: output, shape index: {1}]  }
   0x1   :  { %15 = vsyncpa [#allocation10], 0 }
   0x2   :  { %16 = vsyncpa [#allocation8], 0 }
   0x3   :  { %17 = vsyncpa [#allocation14], 0  ;;  %s2185_s27 = smov [#allocation9]   ;;  %s2186_s29 = smov [#allocation6]  }
   0x4   :  { %s39_s28 = sshll.u32 %s2185_s27, 4  ;;  %s23_s30 = sshll.u32 %s2186_s29, 4  ;;  %s40_s28 = int_to_ptr.vmem [resolvable:$true] %s39_s28  ;;  %s2245_s30 = int_to_ptr.vmem [resolvable:$true] %s23_s30 }
   0x5   :  { %s2067_s11 = scalar_lea.hbm %s3026_s1, 128 }
   0x6   :  { %p2068_p0 = scmp.ne.s32.totalorder %s3026_s1, %s2067_s11  ;;  %p2071_p1 = scmp.lt.u32.totalorder %s2067_s11, %s3026_s1 }
   0x8   :  { %p2073_p2 = pnand %p2071_p1, %p2068_p0 }
   0xa   :  { %2076 = shalt.err (!%p2073_p2)
}
   0xb   :  { %s2077_s16 = scalar_lea.vmem %s40_s28, 128  ;;  %p2082_p4 = scmp.lt.s32.totalorder %s40_s28, %s40_s28 }
   0xc   :  { %p2078_p3 = scmp.ne.s32.totalorder %s40_s28, %s2077_s16  ;;  %p2083_p5 = scmp.lt.s32.totalorder %s2077_s16, %s2077_s16 }
   0xe   :  { %p2084_p6 = por %p2083_p5, %p2082_p4 }
  0x10   :  { %p2085_p7 = pnand %p2084_p6, %p2078_p3 }
  0x12   :  { %2088 = shalt.err (!%p2085_p7)
}
  0x13   :  { %s2187_s17 = smov 16   ;;  %s2188_s18 = smov 1  }
  0x14   :  { %45 = dma.hbm_to_vmem [thread:$0]  %s3026_s1, 128, %s40_s28, [#allocation10], %s2187_s17, %s2187_s17, %s2188_s18  }
  0x15   :  { %s2089_s23 = scalar_lea.hbm %s3025_s0, 128 }
  0x16   :  { %p2090_p8 = scmp.ne.s32.totalorder %s3025_s0, %s2089_s23  ;;  %p2093_p9 = scmp.lt.u32.totalorder %s2089_s23, %s3025_s0 }
  0x18   :  { %p2095_p10 = pnand %p2093_p9, %p2090_p8 }
  0x1a   :  { %2098 = shalt.err (!%p2095_p10)
}
  0x1b   :  { %s2099_s29 = scalar_lea.vmem %s2245_s30, 128  ;;  %p2104_p12 = scmp.lt.s32.totalorder %s2245_s30, %s2245_s30 }
  0x1c   :  { %p2100_p11 = scmp.ne.s32.totalorder %s2245_s30, %s2099_s29  ;;  %p2105_p13 = scmp.lt.s32.totalorder %s2099_s29, %s2099_s29 }
  0x1e   :  { %p2106_p0 = por %p2105_p13, %p2104_p12 }
  0x20   :  { %p2107_p1 = pnand %p2106_p0, %p2100_p11 }
  0x22   :  { %2110 = shalt.err (!%p2107_p1)
}
  0x23   :  { %29 = dma.hbm_to_vmem [thread:$0]  %s3025_s0, 128, %s2245_s30, [#allocation7], %s2187_s17, %s2187_s17, %s2188_s18  }
  0x24   :  { %s2189_s9 = smov [#allocation11]   ;;  %s2111_s13 = scalar_lea.hbm %s3031_s6, 256 }
  0x25   :  { %s59_s10 = sshll.u32 %s2189_s9, 4  ;;  %p2112_p2 = scmp.ne.s32.totalorder %s3031_s6, %s2111_s13  ;;  %s60_s10 = int_to_ptr.vmem [resolvable:$true] %s59_s10 }
  0x26   :  { %p2115_p3 = scmp.lt.u32.totalorder %s2111_s13, %s3031_s6 }
  0x28   :  { %p2117_p4 = pnand %p2115_p3, %p2112_p2 }
  0x2a   :  { %2120 = shalt.err (!%p2117_p4)
}
  0x2b   :  { %s2121_s20 = scalar_lea.vmem %s60_s10, 256  ;;  %p2126_p6 = scmp.lt.s32.totalorder %s60_s10, %s60_s10 }
  0x2c   :  { %p2122_p5 = scmp.ne.s32.totalorder %s60_s10, %s2121_s20  ;;  %p2127_p7 = scmp.lt.s32.totalorder %s2121_s20, %s2121_s20 }
  0x2e   :  { %p2128_p8 = por %p2127_p7, %p2126_p6 }
  0x30   :  { %p2129_p9 = pnand %p2128_p8, %p2122_p5 }
  0x32   :  { %2132 = shalt.err (!%p2129_p9)
}
  0x33   :  { %s2190_s0 = smov 64   ;;  %s2191_s30 = smov 4  }
  0x34   :  { %65 = dma.hbm_to_vmem [thread:$0]  %s3031_s6, 256, %s60_s10, [#allocation10], %s2190_s0, %s2190_s0, %s2191_s30  }
  0x35   :  { %2177 = dma.done.wait [#allocation7], 128  }
  0x36   :  { %2178 = vsyncadd [#allocation7], 4294967168 }
  0x37   :  { %2179 = dma.done.wait [#allocation10], 384  }
  0x38   :  { %2180 = vsyncadd [#allocation10], 4294966912  ;;  %vm84_vm0 = vcmask 254976   ;;  %v2192_v0 = vmov 0.0   ;;  %vm2193_vm1 = vmmov 0   ;;  %v2307_v1 = vld [vmem:[%s3030_s5] sm:$0xff]  }
  0x39   :  { %1784 = vmatprep.subr.bf16.mxu0 %v2192_v0  ;;  %1792 = vmatprep.subr.bf16.mxu1 %v2192_v0  ;;  %85 = vst.msk [vmem:[#allocation2] sm:$0x3] %vm84_vm0, %v2192_v0  ;;  %86 = vst.msk [vmem:[#allocation3] sm:$0x3] %vm84_vm0, %v2192_v0  ;;  %v2309_v2 = vld [vmem:[#allocation11] sm:$0xff]   ;;  %v2315_v3 = vld [vmem:[%s3030_s5 + $0x8] sm:$0xff]  }
  0x3a   :  { %87 = vst.msk [vmem:[#allocation4] sm:$0x3] %vm84_vm0, %v2192_v0  ;;  %88 = vst.msk [vmem:[#allocation5] sm:$0x3] %vm84_vm0, %v2192_v0  ;;  %1788 = vmatprep.mubr.msk.bf16.mxu0 %vm2193_vm1, %v2192_v0  ;;  %1796 = vmatprep.mubr.msk.bf16.mxu1 %vm2193_vm1, %v2192_v0  ;;  %v2319_v4 = vld [vmem:[#allocation11 + $0x8] sm:$0xff]   ;;  %s2194_s24 = smov 32  }
  0x3b   :  { %1785 = vmatpush3.bf16.msra.mxu0 %v2307_v1  ;;  %1793 = vmatpush3.bf16.msra.mxu1 %v2309_v2  ;;  %vm120_vm2 = vcmask 261120   ;;  %v105_v11 = vld [vmem:[#allocation6] sm:$0x1]  ;;  %v221_v12 = vld [vmem:[#allocation9 + $0x7] sm:$0x1]  ;;  %v2195_v29 = vmov 0  }
  0x3c   :  { %1786 = vmatprep.subr.bf16.mxu0 %v2192_v0  ;;  %1794 = vmatprep.subr.bf16.mxu1 %v2192_v0  ;;  %v107_v13 = vunpack.c.l.bf16 %v105_v11  ;;  %v223_v14 = vunpack.c.l.bf16 %v221_v12  ;;  %v2353_v15 = vld [vmem:[%s3028_s3] ss:$0 sm:$0xff]  ;;  %v336_v12 = vld [vmem:[#allocation6 + $0x1] sm:$0x1]  ;;  %s2198_s16 = smov [#allocation13]  }
  0x3d   :  { %v2358_v19 = vld [vmem:[%s3029_s4] ss:$0 sm:$0xff]  ;;  %1927 = vset.pattern.permute.xlu0 %v2195_v29  ;;  %1928 = vset.pattern.permute.xlu1 %v2195_v29  ;;  %s1661_s19 = sshll.u32 %s2198_s16, 4  ;;  %s1662_s19 = int_to_ptr.vmem [resolvable:$true] %s1661_s19 }
  0x3e   :  { %v2369_v38 = vld [vmem:[%s3027_s2] sm:$0x3]  ;;  %s2196_s2 = smov 96  }
  0x3f   :  { %1787 = vmatpush3.bf16.msra.mxu0 %v2315_v3  ;;  %1795 = vmatpush3.bf16.msra.mxu1 %v2319_v4  ;;  %vm1687_vm3 = vcmp.gt.s32.totalorder %v2369_v38, 0  ;;  %vm1693_vm4 = vcmp.gt.s32.totalorder %v2369_v38, 7  ;;  %vm1696_vm7 = vcmp.gt.s32.totalorder %v2369_v38, 1  ;;  %vm1699_vm8 = vcmp.gt.s32.totalorder %v2369_v38, 6 }
  0x40   :  { %v2322_v5 = vld [vmem:[#allocation2] sm:$0x3]  ;;  %v102_v7 = vld [vmem:[#allocation3] sm:$0x3]  ;;  %1800 = vmatprep.subr.bf16.mxu0 %v2192_v0  ;;  %1808 = vmatprep.subr.bf16.mxu1 %v2192_v0  ;;  %v2374_v44 = vsel %vm1687_vm3, 1, %v2195_v29  ;;  %v2380_v46 = vsel %vm1693_vm4, 1, %v2195_v29 }
  0x41   :  { %v2324_v6 = vld [vmem:[#allocation4] sm:$0x3]  ;;  %v106_v8 = vpack.c.bf16 %v2322_v5, %v2322_v5  ;;  %179 = vrot.lane.b32.xlu1 %v102_v7, %s2194_s24  ;;  %v104_v10 = vld [vmem:[#allocation5] sm:$0x3]  ;;  %vm1702_vm11 = vcmp.gt.s32.totalorder %v2369_v38, 2  ;;  %vm1705_vm12 = vcmp.gt.s32.totalorder %v2369_v38, 5 }
  0x42   :  { %v222_v9 = vpack.c.bf16 %v2324_v6, %v2324_v6  ;;  %vm1708_vm15 = vcmp.gt.s32.totalorder %v2369_v38, 3  ;;  %vm1711_vm3 = vcmp.gt.s32.totalorder %v2369_v38, 4 }
  0x43   :  { %1789 = vmatmul.mubr.msk.bf16.vlgmr.msra.gmra.mrb[0].mxu0 %vm120_vm2, %v106_v8 }
  0x44   :  { %1797 = vmatmul.mubr.msk.bf16.vlgmr.msra.gmra.mrb[0].mxu1 %vm120_vm2, %v222_v9  ;;  %1801 = vmatpush3.bf16.msra.mxu0 %v2307_v1 }
  0x45   :  { %294 = vrot.lane.b32.xlu1 %v104_v10, %s2194_s24  ;;  %1802 = vmatprep.subr.bf16.mxu0 %v2192_v0 }
  0x46   :  { %1809 = vmatpush3.bf16.msra.mxu1 %v2309_v2  ;;  %1804 = vmatprep.mubr.msk.bf16.mxu0 %vm2193_vm1, %v2192_v0 }
  0x47   :  { %1810 = vmatprep.subr.bf16.mxu1 %v2192_v0  ;;  %1812 = vmatprep.mubr.msk.bf16.mxu1 %vm2193_vm1, %v2192_v0 }
  0x48   :  { %1803 = vmatpush3.bf16.msra.mxu0 %v2315_v3 }
  0x49   :  { %1816 = vmatprep.subr.bf16.mxu0 %v2192_v0 }
  0x4a   :  { %1811 = vmatpush3.bf16.msra.mxu1 %v2319_v4 }
  0x4b   :  { %1824 = vmatprep.subr.bf16.mxu1 %v2192_v0 }
  0xb3   :  { %v2383_v47 = vpop.permute.xlu1 %179 }
  0xb7   :  { %v2386_v49 = vpop.permute.xlu1 %294 }
 0x116   :  { %v158_v16 = vpop.f32.mrb[0].mxu0 }
 0x117   :  { %v159_v17 = vadd.f32 %v158_v16, %v107_v13  ;;  %v1790_v18 = vpop.f32.mrb[1].mxu0  ;;  %v273_v20 = vpop.f32.mrb[0].mxu1  ;;  %v338_v13 = vunpack.c.l.bf16 %v336_v12 }
 0x118   :  { %v274_v21 = vadd.f32 %v273_v20, %v223_v14  ;;  %v161_v22 = vpop.f32.mrb[2].mxu0  ;;  %v1798_v23 = vpop.f32.mrb[1].mxu1  ;;  %v428_v14 = vld [vmem:[#allocation9 + $0x6] sm:$0x1] }
 0x119   :  { %v170_v24 = vadd.f32 %v2353_v15, %v159_v17  ;;  %v1791_v25 = vpop.f32.mrb[3].mxu0  ;;  %v276_v26 = vpop.f32.mrb[2].mxu1  ;;  %v430_v20 = vunpack.c.l.bf16 %v428_v14 }
 0x11a   :  { %v285_v27 = vadd.f32 %v2358_v19, %v274_v21  ;;  %v1799_v28 = vpop.f32.mrb[3].mxu1 }
 0x11b   :  { %1933 = vtanh.f32 %v170_v24  ;;  %v1686_v32 = vmul.f32 -1.442695, %v170_v24 }
 0x11c   :  { %1935 = vtanh.f32 %v285_v27  ;;  %v1692_v33 = vmul.f32 -1.442695, %v285_v27 }
 0x11d   :  { %1937 = vpow2.f32 %v1686_v32 }
 0x11e   :  { %1939 = vpow2.f32 %v1692_v33 }
 0x125   :  { %v1934_v30 = vpop.eup %1933 }
 0x126   :  { %184 = vrot.lane.b32.xlu0 %v1934_v30, %s2190_s0  ;;  %v1936_v31 = vpop.eup %1935 }
 0x127   :  { %v1938_v34 = vpop.eup %1937 }
 0x128   :  { %v174_v35 = vadd.f32 1.0, %v1938_v34  ;;  %v1940_v36 = vpop.eup %1939 }
 0x129   :  { %v289_v37 = vadd.f32 1.0, %v1940_v36 }
 0x12a   :  { %299 = vrot.lane.b32.xlu0 %v1936_v31, %s2190_s0  ;;  %1941 = vrcp.f32 %v174_v35 }
 0x12b   :  { %1943 = vrcp.f32 %v289_v37 }
 0x134   :  { %v1942_v39 = vpop.eup %1941 }
 0x135   :  { %v1944_v42 = vpop.eup %1943  ;;  %v182_v48 = vmul.f32 %v1942_v39, %v2383_v47 }
 0x136   :  { %v297_v52 = vmul.f32 %v1944_v42, %v2386_v49 }
 0x198   :  { %v185_v40 = vpop.permute.xlu0 %184 }
 0x199   :  { %v187_v41 = vmul.f32 %v1942_v39, %v185_v40 }
 0x19b   :  { %189 = vrot.lane.b32.xlu0 %v187_v41, %s2194_s24 }
 0x19c   :  { %v300_v43 = vpop.permute.xlu0 %299 }
 0x19d   :  { %v302_v45 = vmul.f32 %v1944_v42, %v300_v43 }
 0x19f   :  { %304 = vrot.lane.b32.xlu1 %v302_v45, %s2194_s24  ;;  %203 = vperm.xlu0 %1927, %v2374_v44  }
 0x1a3   :  { %318 = vperm.xlu1 %1928, %v2380_v46  }
 0x20d   :  { %v190_v50 = vpop.permute.xlu0 %189 }
 0x20e   :  { %v2388_v51 = vadd.f32 %v190_v50, %v182_v48  ;;  %v2448_v48 = vsel %vm1696_vm7, 1, %v2195_v29 }
 0x210   :  { %1945 = vtanh.f32 %v2388_v51 }
 0x211   :  { %v305_v53 = vpop.permute.xlu1 %304 }
 0x212   :  { %v2392_v54 = vadd.f32 %v305_v53, %v297_v52  ;;  %v2454_v52 = vsel %vm1699_vm8, 1, %v2195_v29 }
 0x214   :  { %1947 = vtanh.f32 %v2392_v54 }
 0x21a   :  { %v1946_v55 = vpop.eup %1945 }
 0x21b   :  { %195 = vrot.lane.b32.xlu1 %v1946_v55, %s2190_s0 }
 0x21e   :  { %v1948_v56 = vpop.eup %1947  ;;  %v2403_v58 = vpop.permute.xlu0 %203 }
 0x21f   :  { %310 = vrot.lane.b32.xlu0 %v1948_v56, %s2190_s0  ;;  %214 = vrot.lane.b32.xlu1 %v2322_v5, %s2196_s2  ;;  %vm205_vm5 = vcmp.eq.s32.totalorder %v2403_v58, 1 }
 0x220   :  { %v2461_v53 = vsel %vm205_vm5, %v2388_v51, %v2383_v47 }
 0x222   :  { %v2401_v57 = vpop.permute.xlu1 %318 }
 0x223   :  { %329 = vrot.lane.b32.xlu0 %v2324_v6, %s2196_s2  ;;  %vm320_vm6 = vcmp.eq.s32.totalorder %v2401_v57, 1 }
 0x28d   :  { %v196_v59 = vpop.permute.xlu1 %195 }
 0x28e   :  { %v2405_v60 = vmul.f32 %v1942_v39, %v196_v59 }
 0x291   :  { %v311_v61 = vpop.permute.xlu0 %310  ;;  %v215_v62 = vpop.permute.xlu1 %214 }
 0x292   :  { %v2411_v63 = vsel %vm205_vm5, %v2405_v60, %v215_v62  ;;  %v2415_v6 = vmul.f32 %v1944_v42, %v311_v61  ;;  %v2470_v61 = vsel %vm320_vm6, %v2392_v54, %v2386_v49 }
 0x293   :  { %v337_v5 = vpack.c.bf16 %v2411_v63, %v2411_v63 }
 0x295   :  { %v330_v7 = vpop.permute.xlu0 %329  ;;  %340 = vrot.lane.b32.xlu1 %v337_v5, %s2194_s24 }
 0x296   :  { %v2422_v8 = vsel %vm320_vm6, %v2415_v6, %v330_v7 }
 0x297   :  { %v429_v9 = vpack.c.bf16 %v2422_v8, %v2422_v8 }
 0x299   :  { %432 = vrot.lane.b32.xlu0 %v429_v9, %s2194_s24 }
 0x307   :  { %v341_v10 = vpop.permute.xlu1 %340 }
 0x308   :  { %1805 = vmatmul.mubr.msk.bf16.vlgmr.msra.gmra.mrb[4].mxu0 %vm120_vm2, %v341_v10 }
 0x309   :  { %1817 = vmatpush3.bf16.msra.mxu0 %v2307_v1  ;;  %1820 = vmatprep.mubr.msk.bf16.mxu0 %vm2193_vm1, %v2192_v0 }
 0x30a   :  { %1818 = vmatprep.subr.bf16.mxu0 %v2192_v0 }
 0x30b   :  { %v433_v11 = vpop.permute.xlu0 %432 }
 0x30c   :  { %1813 = vmatmul.mubr.msk.bf16.vlgmr.msra.gmra.mrb[4].mxu1 %vm120_vm2, %v433_v11 }
 0x30d   :  { %1819 = vmatpush3.bf16.msra.mxu0 %v2315_v3  ;;  %1825 = vmatpush3.bf16.msra.mxu1 %v2309_v2 }
 0x30e   :  { %1826 = vmatprep.subr.bf16.mxu1 %v2192_v0  ;;  %1828 = vmatprep.mubr.msk.bf16.mxu1 %vm2193_vm1, %v2192_v0 }
 0x30f   :  { %1832 = vmatprep.subr.bf16.mxu0 %v2192_v0 }
 0x311   :  { %1827 = vmatpush3.bf16.msra.mxu1 %v2319_v4 }
 0x312   :  { %1840 = vmatprep.subr.bf16.mxu1 %v2192_v0 }
 0x3db   :  { %v379_v16 = vpop.f32.mrb[4].mxu0 }
 0x3dc   :  { %v380_v17 = vadd.f32 %v379_v16, %v338_v13  ;;  %v1806_v18 = vpop.f32.mrb[5].mxu0 }
 0x3dd   :  { %v382_v21 = vpop.f32.mrb[6].mxu0 }
 0x3de   :  { %v385_v22 = vadd.f32 %v2353_v15, %v380_v17  ;;  %v1807_v23 = vpop.f32.mrb[7].mxu0  ;;  %v612_v21 = vld [vmem:[#allocation9 + $0x5] sm:$0x1] }
 0x3df   :  { %v471_v24 = vpop.f32.mrb[4].mxu1 }
 0x3e0   :  { %1949 = vtanh.f32 %v385_v22  ;;  %v472_v25 = vadd.f32 %v471_v24, %v430_v20  ;;  %v1814_v26 = vpop.f32.mrb[5].mxu1  ;;  %v1695_v33 = vmul.f32 -1.442695, %v385_v22 }
 0x3e1   :  { %v474_v27 = vpop.f32.mrb[6].mxu1 }
 0x3e2   :  { %v477_v28 = vadd.f32 %v2358_v19, %v472_v25  ;;  %v1815_v30 = vpop.f32.mrb[7].mxu1  ;;  %v614_v25 = vunpack.c.l.bf16 %v612_v21 }
 0x3e4   :  { %1951 = vtanh.f32 %v477_v28  ;;  %v1698_v34 = vmul.f32 -1.442695, %v477_v28 }
 0x3e5   :  { %1953 = vpow2.f32 %v1695_v33 }
 0x3e6   :  { %1955 = vpow2.f32 %v1698_v34 }
 0x3ea   :  { %v1950_v31 = vpop.eup %1949 }
 0x3eb   :  { %395 = vrot.lane.b32.xlu1 %v1950_v31, %s2190_s0 }
 0x3ee   :  { %v1952_v32 = vpop.eup %1951 }
 0x3ef   :  { %487 = vrot.lane.b32.xlu0 %v1952_v32, %s2190_s0  ;;  %v1954_v35 = vpop.eup %1953 }
 0x3f0   :  { %v389_v36 = vadd.f32 1.0, %v1954_v35  ;;  %v1956_v37 = vpop.eup %1955 }
 0x3f1   :  { %v481_v39 = vadd.f32 1.0, %v1956_v37 }
 0x3f2   :  { %1957 = vrcp.f32 %v389_v36 }
 0x3f3   :  { %1959 = vrcp.f32 %v481_v39 }
 0x3fc   :  { %v1958_v40 = vpop.eup %1957 }
 0x3fd   :  { %v1960_v43 = vpop.eup %1959  ;;  %v393_v55 = vmul.f32 %v1958_v40, %v2461_v53 }
 0x3fe   :  { %v485_v62 = vmul.f32 %v1960_v43, %v2470_v61 }
 0x45d   :  { %v396_v41 = vpop.permute.xlu1 %395 }
 0x45e   :  { %v398_v42 = vmul.f32 %v1958_v40, %v396_v41 }
 0x460   :  { %400 = vrot.lane.b32.xlu1 %v398_v42, %s2194_s24 }
 0x461   :  { %v488_v45 = vpop.permute.xlu0 %487 }
 0x462   :  { %v490_v50 = vmul.f32 %v1960_v43, %v488_v45 }
 0x464   :  { %492 = vrot.lane.b32.xlu0 %v490_v50, %s2194_s24  ;;  %414 = vperm.xlu1 %1928, %v2448_v48  }
 0x468   :  { %506 = vperm.xlu0 %1927, %v2454_v52  }
 0x4d2   :  { %v401_v56 = vpop.permute.xlu1 %400 }
 0x4d3   :  { %v2464_v59 = vadd.f32 %v401_v56, %v393_v55 }
 0x4d5   :  { %1961 = vtanh.f32 %v2464_v59 }
 0x4d6   :  { %v493_v5 = vpop.permute.xlu0 %492 }
 0x4d7   :  { %v2474_v7 = vadd.f32 %v493_v5, %v485_v62 }
 0x4d9   :  { %1963 = vtanh.f32 %v2474_v7 }
 0x4df   :  { %v1962_v47 = vpop.eup %1961 }
 0x4e0   :  { %406 = vrot.lane.b32.xlu1 %v1962_v47, %s2190_s0  ;;  %v2528_v47 = vsel %vm1702_vm11, 1, %v2195_v29 }
 0x4e3   :  { %v1964_v51 = vpop.eup %1963  ;;  %v2479_v9 = vpop.permute.xlu1 %414 }
 0x4e4   :  { %498 = vrot.lane.b32.xlu0 %v1964_v51, %s2190_s0  ;;  %vm416_vm9 = vcmp.eq.s32.totalorder %v2479_v9, 1 }
 0x4e7   :  { %v2481_v10 = vpop.permute.xlu0 %506 }
 0x4e8   :  { %vm508_vm10 = vcmp.eq.s32.totalorder %v2481_v10, 1 }
 0x552   :  { %v407_v49 = vpop.permute.xlu1 %406 }
 0x553   :  { %v2483_v54 = vmul.f32 %v1958_v40, %v407_v49  ;;  %v2534_v49 = vsel %vm1705_vm12, 1, %v2195_v29 }
 0x555   :  { %v2490_v11 = vsel %vm416_vm9, %v2483_v54, %v2411_v63 }
 0x556   :  { %v499_v12 = vpop.permute.xlu0 %498  ;;  %v521_v13 = vpack.c.bf16 %v2490_v11, %v2490_v11 }
 0x557   :  { %v2494_v14 = vmul.f32 %v1960_v43, %v499_v12  ;;  %v2541_v12 = vsel %vm416_vm9, %v2464_v59, %v2461_v53 }
 0x558   :  { %524 = vrot.lane.b32.xlu1 %v521_v13, %s2194_s24 }
 0x559   :  { %v2502_v16 = vsel %vm508_vm10, %v2494_v14, %v2422_v8  ;;  %v520_v8 = vld [vmem:[#allocation6 + $0x2] sm:$0x1]  ;;  %v509_v58 = vsel %vm508_vm10, %v2494_v14, 0.0 }
 0x55a   :  { %v613_v63 = vpack.c.bf16 %v2502_v16, %v2502_v16  ;;  %v522_v20 = vunpack.c.l.bf16 %v520_v8 }
 0x55c   :  { %616 = vrot.lane.b32.xlu0 %v613_v63, %s2194_s24 }
 0x5ca   :  { %v525_v17 = vpop.permute.xlu1 %524 }
 0x5cb   :  { %1821 = vmatmul.mubr.msk.bf16.vlgmr.msra.gmra.mrb[8].mxu0 %vm120_vm2, %v525_v17 }
 0x5cc   :  { %1833 = vmatpush3.bf16.msra.mxu0 %v2307_v1  ;;  %1836 = vmatprep.mubr.msk.bf16.mxu0 %vm2193_vm1, %v2192_v0 }
 0x5cd   :  { %1834 = vmatprep.subr.bf16.mxu0 %v2192_v0 }
 0x5ce   :  { %v617_v18 = vpop.permute.xlu0 %616 }
 0x5cf   :  { %1829 = vmatmul.mubr.msk.bf16.vlgmr.msra.gmra.mrb[8].mxu1 %vm120_vm2, %v617_v18  ;;  %v2550_v18 = vsel %vm508_vm10, %v2474_v7, %v2470_v61 }
 0x5d0   :  { %1835 = vmatpush3.bf16.msra.mxu0 %v2315_v3  ;;  %1841 = vmatpush3.bf16.msra.mxu1 %v2309_v2 }
 0x5d1   :  { %1842 = vmatprep.subr.bf16.mxu1 %v2192_v0  ;;  %1844 = vmatprep.mubr.msk.bf16.mxu1 %vm2193_vm1, %v2192_v0 }
 0x5d2   :  { %1848 = vmatprep.subr.bf16.mxu0 %v2192_v0 }
 0x5d4   :  { %1843 = vmatpush3.bf16.msra.mxu1 %v2319_v4 }
 0x5d5   :  { %1856 = vmatprep.subr.bf16.mxu1 %v2192_v0 }
 0x69e   :  { %v563_v22 = vpop.f32.mrb[8].mxu0 }
 0x69f   :  { %v564_v23 = vadd.f32 %v563_v22, %v522_v20  ;;  %v1822_v24 = vpop.f32.mrb[9].mxu0 }
 0x6a0   :  { %v566_v26 = vpop.f32.mrb[10].mxu0 }
 0x6a1   :  { %v569_v27 = vadd.f32 %v2353_v15, %v564_v23  ;;  %v1823_v28 = vpop.f32.mrb[11].mxu0 }
 0x6a2   :  { %v655_v30 = vpop.f32.mrb[8].mxu1 }
 0x6a3   :  { %1965 = vtanh.f32 %v569_v27  ;;  %v656_v31 = vadd.f32 %v655_v30, %v614_v25  ;;  %v1830_v32 = vpop.f32.mrb[9].mxu1  ;;  %v1701_v39 = vmul.f32 -1.442695, %v569_v27 }
 0x6a4   :  { %v658_v33 = vpop.f32.mrb[10].mxu1 }
 0x6a5   :  { %v661_v34 = vadd.f32 %v2358_v19, %v656_v31  ;;  %v1831_v35 = vpop.f32.mrb[11].mxu1  ;;  %v796_v33 = vld [vmem:[#allocation9 + $0x4] sm:$0x1] }
 0x6a7   :  { %1967 = vtanh.f32 %v661_v34  ;;  %v1704_v40 = vmul.f32 -1.442695, %v661_v34 }
 0x6a8   :  { %1969 = vpow2.f32 %v1701_v39 }
 0x6a9   :  { %1971 = vpow2.f32 %v1704_v40 }
 0x6ad   :  { %v1966_v36 = vpop.eup %1965 }
 0x6ae   :  { %579 = vrot.lane.b32.xlu1 %v1966_v36, %s2190_s0 }
 0x6b1   :  { %v1968_v37 = vpop.eup %1967 }
 0x6b2   :  { %671 = vrot.lane.b32.xlu0 %v1968_v37, %s2190_s0  ;;  %v1970_v41 = vpop.eup %1969  ;;  %v798_v37 = vunpack.c.l.bf16 %v796_v33 }
 0x6b3   :  { %v573_v42 = vadd.f32 1.0, %v1970_v41  ;;  %v1972_v43 = vpop.eup %1971 }
 0x6b4   :  { %v665_v45 = vadd.f32 1.0, %v1972_v43 }
 0x6b5   :  { %1973 = vrcp.f32 %v573_v42 }
 0x6b6   :  { %1975 = vrcp.f32 %v665_v45 }
 0x6bf   :  { %v1974_v50 = vpop.eup %1973 }
 0x6c0   :  { %v1976_v62 = vpop.eup %1975  ;;  %v577_v13 = vmul.f32 %v1974_v50, %v2541_v12 }
 0x6c1   :  { %v669_v8 = vmul.f32 %v1976_v62, %v2550_v18 }
 0x720   :  { %v580_v55 = vpop.permute.xlu1 %579 }
 0x721   :  { %v582_v56 = vmul.f32 %v1974_v50, %v580_v55 }
 0x723   :  { %584 = vrot.lane.b32.xlu1 %v582_v56, %s2194_s24 }
 0x724   :  { %v672_v5 = vpop.permute.xlu0 %671 }
 0x725   :  { %v674_v51 = vmul.f32 %v1976_v62, %v672_v5 }
 0x727   :  { %676 = vrot.lane.b32.xlu0 %v674_v51, %s2194_s24  ;;  %598 = vperm.xlu1 %1928, %v2528_v47  }
 0x72b   :  { %690 = vperm.xlu0 %1927, %v2534_v49  }
 0x795   :  { %v585_v63 = vpop.permute.xlu1 %584 }
 0x796   :  { %v2544_v17 = vadd.f32 %v585_v63, %v577_v13 }
 0x798   :  { %1977 = vtanh.f32 %v2544_v17 }
 0x799   :  { %v677_v20 = vpop.permute.xlu0 %676 }
 0x79a   :  { %v2554_v21 = vadd.f32 %v677_v20, %v669_v8 }
 0x79c   :  { %1979 = vtanh.f32 %v2554_v21 }
 0x7a2   :  { %v1978_v53 = vpop.eup %1977 }
 0x7a3   :  { %590 = vrot.lane.b32.xlu1 %v1978_v53, %s2190_s0 }
 0x7a6   :  { %v1980_v59 = vpop.eup %1979  ;;  %v2559_v22 = vpop.permute.xlu1 %598 }
 0x7a7   :  { %682 = vrot.lane.b32.xlu0 %v1980_v59, %s2190_s0  ;;  %vm600_vm13 = vcmp.eq.s32.totalorder %v2559_v22, 1 }
 0x7aa   :  { %v2561_v23 = vpop.permute.xlu0 %690 }
 0x7ab   :  { %vm692_vm14 = vcmp.eq.s32.totalorder %v2561_v23, 1 }
 0x7ac   :  { %v2630_v38 = vsel %vm692_vm14, %v2554_v21, %v2550_v18 }
 0x815   :  { %v591_v61 = vpop.permute.xlu1 %590 }
 0x816   :  { %v2563_v7 = vmul.f32 %v1974_v50, %v591_v61 }
 0x818   :  { %v2570_v24 = vsel %vm600_vm13, %v2563_v7, %v2490_v11 }
 0x819   :  { %v683_v25 = vpop.permute.xlu0 %682  ;;  %v705_v26 = vpack.c.bf16 %v2570_v24, %v2570_v24 }
 0x81a   :  { %v2574_v27 = vmul.f32 %v1976_v62, %v683_v25 }
 0x81b   :  { %708 = vrot.lane.b32.xlu1 %v705_v26, %s2194_s24 }
 0x81c   :  { %v2582_v28 = vsel %vm692_vm14, %v2574_v27, %v2502_v16  ;;  %v704_v16 = vld [vmem:[#allocation6 + $0x3] sm:$0x1]  ;;  %v693_v57 = vsel %vm692_vm14, %v2574_v27, 0.0 }
 0x81d   :  { %v797_v11 = vpack.c.bf16 %v2582_v28, %v2582_v28  ;;  %v706_v32 = vunpack.c.l.bf16 %v704_v16  ;;  %v2614_v16 = vsel %vm1711_vm3, 1, %v2195_v29 }
 0x81f   :  { %800 = vrot.lane.b32.xlu0 %v797_v11, %s2194_s24 }
 0x88d   :  { %v709_v30 = vpop.permute.xlu1 %708 }
 0x88e   :  { %1837 = vmatmul.mubr.msk.bf16.vlgmr.msra.gmra.mrb[12].mxu0 %vm120_vm2, %v709_v30  ;;  %v2608_v30 = vsel %vm1708_vm15, 1, %v2195_v29 }
 0x88f   :  { %1849 = vmatpush3.bf16.msra.mxu0 %v2307_v1  ;;  %1852 = vmatprep.mubr.msk.bf16.mxu0 %vm2193_vm1, %v2192_v0 }
 0x890   :  { %1850 = vmatprep.subr.bf16.mxu0 %v2192_v0 }
 0x891   :  { %v801_v31 = vpop.permute.xlu0 %800 }
 0x892   :  { %1845 = vmatmul.mubr.msk.bf16.vlgmr.msra.gmra.mrb[12].mxu1 %vm120_vm2, %v801_v31 }
 0x893   :  { %1851 = vmatpush3.bf16.msra.mxu0 %v2315_v3  ;;  %1857 = vmatpush3.bf16.msra.mxu1 %v2309_v2 }
 0x894   :  { %1858 = vmatprep.subr.bf16.mxu1 %v2192_v0  ;;  %1860 = vmatprep.mubr.msk.bf16.mxu1 %vm2193_vm1, %v2192_v0 }
 0x895   :  { %1864 = vmatprep.subr.bf16.mxu0 %v2192_v0 }
 0x897   :  { %1859 = vmatpush3.bf16.msra.mxu1 %v2319_v4 }
 0x898   :  { %1872 = vmatprep.subr.bf16.mxu1 %v2192_v0 }
 0x961   :  { %v747_v34 = vpop.f32.mrb[12].mxu0 }
 0x962   :  { %v748_v35 = vadd.f32 %v747_v34, %v706_v32  ;;  %v1838_v36 = vpop.f32.mrb[13].mxu0  ;;  %v2621_v32 = vsel %vm600_vm13, %v2544_v17, %v2541_v12 }
 0x963   :  { %v750_v39 = vpop.f32.mrb[14].mxu0 }
 0x964   :  { %v753_v40 = vadd.f32 %v2353_v15, %v748_v35  ;;  %v1839_v41 = vpop.f32.mrb[15].mxu0 }
 0x965   :  { %v839_v42 = vpop.f32.mrb[12].mxu1 }
 0x966   :  { %1981 = vtanh.f32 %v753_v40  ;;  %v840_v43 = vadd.f32 %v839_v42, %v798_v37  ;;  %v1846_v45 = vpop.f32.mrb[13].mxu1  ;;  %v1707_v51 = vmul.f32 -1.442695, %v753_v40 }
 0x967   :  { %v842_v50 = vpop.f32.mrb[14].mxu1 }
 0x968   :  { %v845_v55 = vadd.f32 %v2358_v19, %v840_v43  ;;  %v1847_v56 = vpop.f32.mrb[15].mxu1 }
 0x96a   :  { %1983 = vtanh.f32 %v845_v55  ;;  %v1710_v13 = vmul.f32 -1.442695, %v845_v55 }
 0x96b   :  { %1985 = vpow2.f32 %v1707_v51 }
 0x96c   :  { %1987 = vpow2.f32 %v1710_v13 }
 0x970   :  { %v1982_v62 = vpop.eup %1981 }
 0x971   :  { %763 = vrot.lane.b32.xlu1 %v1982_v62, %s2190_s0 }
 0x974   :  { %v1984_v5 = vpop.eup %1983 }
 0x975   :  { %855 = vrot.lane.b32.xlu0 %v1984_v5, %s2190_s0  ;;  %v1986_v63 = vpop.eup %1985  ;;  %v980_v5 = vld [vmem:[#allocation9 + $0x3] sm:$0x1] }
 0x976   :  { %v757_v8 = vadd.f32 1.0, %v1986_v63  ;;  %v1988_v20 = vpop.eup %1987 }
 0x977   :  { %v849_v53 = vadd.f32 1.0, %v1988_v20 }
 0x978   :  { %1989 = vrcp.f32 %v757_v8  ;;  %v982_v8 = vunpack.c.l.bf16 %v980_v5 }
 0x979   :  { %1991 = vrcp.f32 %v849_v53 }
 0x982   :  { %v1990_v59 = vpop.eup %1989 }
 0x983   :  { %v1992_v26 = vpop.eup %1991  ;;  %v761_v33 = vmul.f32 %v1990_v59, %v2621_v32 }
 0x984   :  { %v853_v29 = vmul.f32 %v1992_v26, %v2630_v38 }
 0x9e3   :  { %v764_v61 = vpop.permute.xlu1 %763 }
 0x9e4   :  { %v766_v25 = vmul.f32 %v1990_v59, %v764_v61 }
 0x9e6   :  { %768 = vrot.lane.b32.xlu1 %v766_v25, %s2194_s24 }
 0x9e7   :  { %v856_v11 = vpop.permute.xlu0 %855 }
 0x9e8   :  { %v858_v31 = vmul.f32 %v1992_v26, %v856_v11 }
 0x9ea   :  { %860 = vrot.lane.b32.xlu0 %v858_v31, %s2194_s24  ;;  %782 = vperm.xlu1 %1928, %v2608_v30  }
 0x9ee   :  { %874 = vperm.xlu0 %1927, %v2614_v16  }
 0xa58   :  { %v769_v34 = vpop.permute.xlu1 %768 }
 0xa59   :  { %v2624_v35 = vadd.f32 %v769_v34, %v761_v33 }
 0xa5b   :  { %1993 = vtanh.f32 %v2624_v35 }
 0xa5c   :  { %v861_v36 = vpop.permute.xlu0 %860 }
 0xa5d   :  { %v2634_v37 = vadd.f32 %v861_v36, %v853_v29 }
 0xa5f   :  { %1995 = vtanh.f32 %v2634_v37 }
 0xa65   :  { %v1994_v12 = vpop.eup %1993 }
 0xa66   :  { %774 = vrot.lane.b32.xlu1 %v1994_v12, %s2190_s0 }
 0xa69   :  { %v1996_v17 = vpop.eup %1995  ;;  %v2639_v39 = vpop.permute.xlu1 %782 }
 0xa6a   :  { %866 = vrot.lane.b32.xlu0 %v1996_v17, %s2190_s0  ;;  %vm784_vm4 = vcmp.eq.s32.totalorder %v2639_v39, 1 }
 0xa6d   :  { %v2641_v40 = vpop.permute.xlu0 %874 }
 0xa6e   :  { %vm876_vm7 = vcmp.eq.s32.totalorder %v2641_v40, 1 }
 0xad8   :  { %v775_v18 = vpop.permute.xlu1 %774 }
 0xad9   :  { %v2643_v21 = vmul.f32 %v1990_v59, %v775_v18 }
 0xadb   :  { %v2650_v41 = vsel %vm784_vm4, %v2643_v21, %v2570_v24 }
 0xadc   :  { %v867_v42 = vpop.permute.xlu0 %866  ;;  %v889_v43 = vpack.c.bf16 %v2650_v41, %v2650_v41 }
 0xadd   :  { %v2654_v45 = vmul.f32 %v1992_v26, %v867_v42 }
 0xade   :  { %892 = vrot.lane.b32.xlu1 %v889_v43, %s2194_s24 }
 0xadf   :  { %v2662_v50 = vsel %vm876_vm7, %v2654_v45, %v2582_v28  ;;  %v888_v28 = vld [vmem:[#allocation6 + $0x4] sm:$0x1]  ;;  %v877_v9 = vsel %vm876_vm7, %v2654_v45, 0.0 }
 0xae0   :  { %v981_v24 = vpack.c.bf16 %v2662_v50, %v2662_v50  ;;  %v890_v62 = vunpack.c.l.bf16 %v888_v28 }
 0xae2   :  { %984 = vrot.lane.b32.xlu0 %v981_v24, %s2194_s24 }
 0xb50   :  { %v893_v55 = vpop.permute.xlu1 %892 }
 0xb51   :  { %1853 = vmatmul.mubr.msk.bf16.vlgmr.msra.gmra.mrb[16].mxu0 %vm120_vm2, %v893_v55 }
 0xb52   :  { %1865 = vmatpush3.bf16.msra.mxu0 %v2307_v1  ;;  %1868 = vmatprep.mubr.msk.bf16.mxu0 %vm2193_vm1, %v2192_v0 }
 0xb53   :  { %1866 = vmatprep.subr.bf16.mxu0 %v2192_v0 }
 0xb54   :  { %v985_v56 = vpop.permute.xlu0 %984 }
 0xb55   :  { %1861 = vmatmul.mubr.msk.bf16.vlgmr.msra.gmra.mrb[16].mxu1 %vm120_vm2, %v985_v56 }
 0xb56   :  { %1867 = vmatpush3.bf16.msra.mxu0 %v2315_v3  ;;  %1873 = vmatpush3.bf16.msra.mxu1 %v2309_v2 }
 0xb57   :  { %1874 = vmatprep.subr.bf16.mxu1 %v2192_v0  ;;  %1876 = vmatprep.mubr.msk.bf16.mxu1 %vm2193_vm1, %v2192_v0 }
 0xb58   :  { %1880 = vmatprep.subr.bf16.mxu0 %v2192_v0 }
 0xb5a   :  { %1875 = vmatpush3.bf16.msra.mxu1 %v2319_v4 }
 0xb5b   :  { %1888 = vmatprep.subr.bf16.mxu1 %v2192_v0 }
 0xc24   :  { %v931_v51 = vpop.f32.mrb[16].mxu0 }
 0xc25   :  { %v932_v13 = vadd.f32 %v931_v51, %v890_v62  ;;  %v1854_v63 = vpop.f32.mrb[17].mxu0  ;;  %v2693_v51 = vsel %vm784_vm4, %v2624_v35, %v2621_v32 }
 0xc26   :  { %v934_v20 = vpop.f32.mrb[18].mxu0 }
 0xc27   :  { %v937_v53 = vadd.f32 %v2353_v15, %v932_v13  ;;  %v1855_v59 = vpop.f32.mrb[19].mxu0  ;;  %v2702_v20 = vsel %vm876_vm7, %v2634_v37, %v2630_v38 }
 0xc28   :  { %v1023_v61 = vpop.f32.mrb[16].mxu1 }
 0xc29   :  { %1997 = vtanh.f32 %v937_v53  ;;  %v1024_v25 = vadd.f32 %v1023_v61, %v982_v8  ;;  %v1862_v26 = vpop.f32.mrb[17].mxu1  ;;  %v1713_v36 = vmul.f32 -1.442695, %v937_v53 }
 0xc2a   :  { %v1026_v11 = vpop.f32.mrb[18].mxu1 }
 0xc2b   :  { %v1029_v31 = vadd.f32 %v2358_v19, %v1024_v25  ;;  %v1863_v33 = vpop.f32.mrb[19].mxu1 }
 0xc2d   :  { %1999 = vtanh.f32 %v1029_v31  ;;  %v1716_v12 = vmul.f32 -1.442695, %v1029_v31 }
 0xc2e   :  { %2001 = vpow2.f32 %v1713_v36  ;;  %v1164_v36 = vld [vmem:[#allocation9 + $0x2] sm:$0x1] }
 0xc2f   :  { %2003 = vpow2.f32 %v1716_v12 }
 0xc33   :  { %v1998_v34 = vpop.eup %1997 }
 0xc34   :  { %947 = vrot.lane.b32.xlu1 %v1998_v34, %s2190_s0 }
 0xc37   :  { %v2000_v29 = vpop.eup %1999 }
 0xc38   :  { %1039 = vrot.lane.b32.xlu0 %v2000_v29, %s2190_s0  ;;  %v2002_v17 = vpop.eup %2001 }
 0xc39   :  { %v941_v18 = vadd.f32 1.0, %v2002_v17  ;;  %v2004_v42 = vpop.eup %2003 }
 0xc3a   :  { %v1033_v43 = vadd.f32 1.0, %v2004_v42 }
 0xc3b   :  { %2005 = vrcp.f32 %v941_v18 }
 0xc3c   :  { %2007 = vrcp.f32 %v1033_v43 }
 0xc45   :  { %v2006_v24 = vpop.eup %2005 }
 0xc46   :  { %v2008_v28 = vpop.eup %2007  ;;  %v945_v13 = vmul.f32 %v2006_v24, %v2693_v51 }
 0xca6   :  { %v948_v55 = vpop.permute.xlu1 %947 }
 0xca7   :  { %v950_v56 = vmul.f32 %v2006_v24, %v948_v55 }
 0xca9   :  { %952 = vrot.lane.b32.xlu1 %v950_v56, %s2194_s24 }
 0xcaa   :  { %v1040_v62 = vpop.permute.xlu0 %1039 }
 0xcab   :  { %v1042_v5 = vmul.f32 %v2008_v28, %v1040_v62 }
 0xcad   :  { %1044 = vrot.lane.b32.xlu0 %v1042_v5, %s2194_s24  ;;  %966 = vperm.xlu1 %1928, %v2614_v16  }
 0xcb1   :  { %1058 = vperm.xlu0 %1927, %v2608_v30   ;;  %v1037_v30 = vmul.f32 %v2008_v28, %v2702_v20 }
 0xd1b   :  { %v953_v63 = vpop.permute.xlu1 %952 }
 0xd1c   :  { %v2696_v8 = vadd.f32 %v953_v63, %v945_v13 }
 0xd1e   :  { %2009 = vtanh.f32 %v2696_v8 }
 0xd1f   :  { %v1045_v16 = vpop.permute.xlu0 %1044 }
 0xd20   :  { %v2706_v53 = vadd.f32 %v1045_v16, %v1037_v30 }
 0xd22   :  { %2011 = vtanh.f32 %v2706_v53 }
 0xd28   :  { %v2010_v32 = vpop.eup %2009 }
 0xd29   :  { %958 = vrot.lane.b32.xlu1 %v2010_v32, %s2190_s0 }
 0xd2c   :  { %v2012_v35 = vpop.eup %2011  ;;  %v2711_v59 = vpop.permute.xlu1 %966 }
 0xd2d   :  { %1050 = vrot.lane.b32.xlu0 %v2012_v35, %s2190_s0  ;;  %vm968_vm8 = vcmp.eq.s32.totalorder %v2711_v59, 1 }
 0xd30   :  { %v2713_v61 = vpop.permute.xlu0 %1058 }
 0xd31   :  { %vm1060_vm11 = vcmp.eq.s32.totalorder %v2713_v61, 1 }
 0xd9b   :  { %v959_v38 = vpop.permute.xlu1 %958 }
 0xd9c   :  { %v2715_v37 = vmul.f32 %v2006_v24, %v959_v38 }
 0xd9e   :  { %v2722_v25 = vsel %vm968_vm8, %v2715_v37, %v2650_v41  ;;  %v969_v10 = vsel %vm968_vm8, %v2715_v37, 0.0 }
 0xd9f   :  { %v1051_v26 = vpop.permute.xlu0 %1050  ;;  %v1073_v11 = vpack.c.bf16 %v2722_v25, %v2722_v25 }
 0xda0   :  { %v2726_v31 = vmul.f32 %v2008_v28, %v1051_v26 }
 0xda1   :  { %1076 = vrot.lane.b32.xlu1 %v1073_v11, %s2194_s24 }
 0xda2   :  { %v2734_v33 = vsel %vm1060_vm11, %v2726_v31, %v2662_v50 }
 0xda3   :  { %v1165_v41 = vpack.c.bf16 %v2734_v33, %v2734_v33 }
 0xda5   :  { %1168 = vrot.lane.b32.xlu0 %v1165_v41, %s2194_s24 }
 0xe13   :  { %v1077_v34 = vpop.permute.xlu1 %1076 }
 0xe14   :  { %1869 = vmatmul.mubr.msk.bf16.vlgmr.msra.gmra.mrb[20].mxu0 %vm120_vm2, %v1077_v34 }
 0xe15   :  { %1881 = vmatpush3.bf16.msra.mxu0 %v2307_v1  ;;  %1884 = vmatprep.mubr.msk.bf16.mxu0 %vm2193_vm1, %v2192_v0  ;;  %v1072_v1 = vld [vmem:[#allocation6 + $0x5] sm:$0x1] }
 0xe16   :  { %1882 = vmatprep.subr.bf16.mxu0 %v2192_v0  ;;  %v1074_v50 = vunpack.c.l.bf16 %v1072_v1 }
 0xe17   :  { %v1169_v29 = vpop.permute.xlu0 %1168 }
 0xe18   :  { %1877 = vmatmul.mubr.msk.bf16.vlgmr.msra.gmra.mrb[20].mxu1 %vm120_vm2, %v1169_v29  ;;  %v2765_v29 = vsel %vm968_vm8, %v2696_v8, %v2693_v51 }
 0xe19   :  { %1883 = vmatpush3.bf16.msra.mxu0 %v2315_v3  ;;  %1889 = vmatpush3.bf16.msra.mxu1 %v2309_v2  ;;  %v1166_v3 = vunpack.c.l.bf16 %v1164_v36 }
 0xe1a   :  { %1890 = vmatprep.subr.bf16.mxu1 %v2192_v0  ;;  %1892 = vmatprep.mubr.msk.bf16.mxu1 %vm2193_vm1, %v2192_v0 }
 0xe1b   :  { %1896 = vmatprep.subr.bf16.mxu0 %v2192_v0 }
 0xe1d   :  { %1891 = vmatpush3.bf16.msra.mxu1 %v2319_v4 }
 0xe1e   :  { %1904 = vmatprep.subr.bf16.mxu1 %v2192_v0 }
 0xee7   :  { %v1115_v12 = vpop.f32.mrb[20].mxu0 }
 0xee8   :  { %v1116_v17 = vadd.f32 %v1115_v12, %v1074_v50  ;;  %v1870_v18 = vpop.f32.mrb[21].mxu0  ;;  %v2774_v12 = vsel %vm1060_vm11, %v2706_v53, %v2702_v20 }
 0xee9   :  { %v1118_v42 = vpop.f32.mrb[22].mxu0 }
 0xeea   :  { %v1121_v2 = vadd.f32 %v2353_v15, %v1116_v17  ;;  %v1871_v43 = vpop.f32.mrb[23].mxu0 }
 0xeeb   :  { %v1207_v24 = vpop.f32.mrb[20].mxu1 }
 0xeec   :  { %2013 = vtanh.f32 %v1121_v2  ;;  %v1208_v55 = vadd.f32 %v1207_v24, %v1166_v3  ;;  %v1878_v56 = vpop.f32.mrb[21].mxu1  ;;  %v1719_v63 = vmul.f32 -1.442695, %v1121_v2 }
 0xeed   :  { %v1210_v28 = vpop.f32.mrb[22].mxu1 }
 0xeee   :  { %v1213_v4 = vadd.f32 %v2358_v19, %v1208_v55  ;;  %v1879_v62 = vpop.f32.mrb[23].mxu1  ;;  %v2061_v28 = vld [vmem:[%s3030_s5] sm:$0xff]  }
 0xeef   :  { %v2063_v62 = vld [vmem:[#allocation11] sm:$0xff]  }
 0xef0   :  { %2015 = vtanh.f32 %v1213_v4  ;;  %v1722_v30 = vmul.f32 -1.442695, %v1213_v4  ;;  %v2062_v4 = vld [vmem:[%s3030_s5 + $0x8] sm:$0xff]  }
 0xef1   :  { %2017 = vpow2.f32 %v1719_v63 }
 0xef2   :  { %2019 = vpow2.f32 %v1722_v30  ;;  %v1348_v30 = vld [vmem:[#allocation9 + $0x1] sm:$0x1] }
 0xef6   :  { %v2014_v5 = vpop.eup %2013 }
 0xef7   :  { %1131 = vrot.lane.b32.xlu1 %v2014_v5, %s2190_s0  ;;  %v2064_v5 = vld [vmem:[#allocation11 + $0x8] sm:$0xff]  }
 0xefa   :  { %v2016_v13 = vpop.eup %2015 }
 0xefb   :  { %1223 = vrot.lane.b32.xlu0 %v2016_v13, %s2190_s0  ;;  %v2018_v15 = vpop.eup %2017  ;;  %v1256_v13 = vld [vmem:[#allocation6 + $0x6] sm:$0x1] }
 0xefc   :  { %v1125_v16 = vadd.f32 1.0, %v2018_v15  ;;  %v2020_v32 = vpop.eup %2019  ;;  %v1258_v63 = vunpack.c.l.bf16 %v1256_v13 }
 0xefd   :  { %v1217_v35 = vadd.f32 1.0, %v2020_v32 }
 0xefe   :  { %2021 = vrcp.f32 %v1125_v16 }
 0xeff   :  { %2023 = vrcp.f32 %v1217_v35  ;;  %v1350_v35 = vunpack.c.l.bf16 %v1348_v30 }
 0xf08   :  { %v2022_v38 = vpop.eup %2021 }
 0xf09   :  { %v2024_v11 = vpop.eup %2023  ;;  %v1129_v1 = vmul.f32 %v2022_v38, %v2765_v29 }
 0xf69   :  { %v1132_v19 = vpop.permute.xlu1 %1131 }
 0xf6a   :  { %v1134_v26 = vmul.f32 %v2022_v38, %v1132_v19  ;;  %v2828_v19 = vld [vmem:[%s3028_s3] ss:$0 sm:$0xff]  ;;  %s2197_s3 = smov [#allocation12]  }
 0xf6c   :  { %1136 = vrot.lane.b32.xlu1 %v1134_v26, %s2194_s24 }
 0xf6d   :  { %v1224_v41 = vpop.permute.xlu0 %1223 }
 0xf6e   :  { %v1226_v34 = vmul.f32 %v2024_v11, %v1224_v41 }
 0xf70   :  { %1228 = vrot.lane.b32.xlu0 %v1226_v34, %s2194_s24  ;;  %1150 = vperm.xlu1 %1928, %v2534_v49  }
 0xf74   :  { %1242 = vperm.xlu0 %1927, %v2528_v47   ;;  %v1221_v47 = vmul.f32 %v2024_v11, %v2774_v12 }
 0xfde   :  { %v1137_v50 = vpop.permute.xlu1 %1136 }
 0xfdf   :  { %v2768_v36 = vadd.f32 %v1137_v50, %v1129_v1  ;;  %v2834_v50 = vld [vmem:[%s3029_s4] ss:$0 sm:$0xff]  ;;  %s1645_s4 = sshll.u32 %s2197_s3, 4  ;;  %s1646_s4 = int_to_ptr.vmem [resolvable:$true] %s1645_s4 }
 0xfe0   :  { %s2133_s20 = scalar_lea.vmem %s1646_s4, 256  ;;  %p2138_p11 = scmp.lt.s32.totalorder %s1646_s4, %s1646_s4 }
 0xfe1   :  { %2025 = vtanh.f32 %v2768_v36  ;;  %p2134_p10 = scmp.ne.s32.totalorder %s1646_s4, %s2133_s20  ;;  %p2139_p12 = scmp.lt.s32.totalorder %s2133_s20, %s2133_s20 }
 0xfe2   :  { %v1229_v49 = vpop.permute.xlu0 %1228 }
 0xfe3   :  { %v2778_v17 = vadd.f32 %v1229_v49, %v1221_v47  ;;  %p2140_p13 = por %p2139_p12, %p2138_p11 }
 0xfe5   :  { %2027 = vtanh.f32 %v2778_v17  ;;  %p2141_p0 = pnand %p2140_p13, %p2134_p10 }
 0xfeb   :  { %v2026_v51 = vpop.eup %2025 }
 0xfec   :  { %1142 = vrot.lane.b32.xlu1 %v2026_v51, %s2190_s0 }
 0xfef   :  { %v2028_v8 = vpop.eup %2027  ;;  %v2783_v18 = vpop.permute.xlu1 %1150 }
 0xff0   :  { %1234 = vrot.lane.b32.xlu0 %v2028_v8, %s2190_s0  ;;  %vm1152_vm12 = vcmp.eq.s32.totalorder %v2783_v18, 1 }
 0xff1   :  { %v2847_v30 = vsel %vm1152_vm12, %v2768_v36, %v2765_v29 }
 0xff3   :  { %v2785_v3 = vpop.permute.xlu0 %1242 }
 0xff4   :  { %vm1244_vm15 = vcmp.eq.s32.totalorder %v2785_v3, 1 }
0x105e   :  { %v1143_v20 = vpop.permute.xlu1 %1142 }
0x105f   :  { %v2787_v53 = vmul.f32 %v2022_v38, %v1143_v20 }
0x1061   :  { %v2794_v42 = vsel %vm1152_vm12, %v2787_v53, %v2722_v25  ;;  %v1153_v14 = vsel %vm1152_vm12, %v2787_v53, 0.0 }
0x1062   :  { %v1235_v2 = vpop.permute.xlu0 %1234  ;;  %v1257_v43 = vpack.c.bf16 %v2794_v42, %v2794_v42 }
0x1063   :  { %v2798_v24 = vmul.f32 %v2024_v11, %v1235_v2 }
0x1064   :  { %1260 = vrot.lane.b32.xlu1 %v1257_v43, %s2194_s24 }
0x1065   :  { %v2806_v55 = vsel %vm1244_vm15, %v2798_v24, %v2734_v33  ;;  %v1245_v22 = vsel %vm1244_vm15, %v2798_v24, 0.0 }
0x1066   :  { %v1349_v25 = vpack.c.bf16 %v2806_v55, %v2806_v55 }
0x1068   :  { %1352 = vrot.lane.b32.xlu0 %v1349_v25, %s2194_s24 }
0x10d6   :  { %v1261_v56 = vpop.permute.xlu1 %1260 }
0x10d7   :  { %1885 = vmatmul.mubr.msk.bf16.vlgmr.msra.gmra.mrb[24].mxu0 %vm120_vm2, %v1261_v56 }
0x10d8   :  { %1897 = vmatpush3.bf16.msra.mxu0 %v2061_v28  ;;  %1900 = vmatprep.mubr.msk.bf16.mxu0 %vm2193_vm1, %v2192_v0 }
0x10d9   :  { %1898 = vmatprep.subr.bf16.mxu0 %v2192_v0 }
0x10da   :  { %v1353_v33 = vpop.permute.xlu0 %1352 }
0x10db   :  { %1893 = vmatmul.mubr.msk.bf16.vlgmr.msra.gmra.mrb[24].mxu1 %vm120_vm2, %v1353_v33 }
0x10dc   :  { %1899 = vmatpush3.bf16.msra.mxu0 %v2062_v4  ;;  %1905 = vmatpush3.bf16.msra.mxu1 %v2063_v62 }
0x10dd   :  { %1906 = vmatprep.subr.bf16.mxu1 %v2192_v0  ;;  %1908 = vmatprep.mubr.msk.bf16.mxu1 %vm2193_vm1, %v2192_v0 }
0x10e0   :  { %1907 = vmatpush3.bf16.msra.mxu1 %v2064_v5 }
0x11aa   :  { %v1299_v15 = vpop.f32.mrb[24].mxu0 }
0x11ab   :  { %v1300_v16 = vadd.f32 %v1299_v15, %v1258_v63  ;;  %v1886_v32 = vpop.f32.mrb[25].mxu0 }
0x11ac   :  { %v1302_v38 = vpop.f32.mrb[26].mxu0 }
0x11ad   :  { %v1305_v26 = vadd.f32 %v2828_v19, %v1300_v16  ;;  %v1887_v11 = vpop.f32.mrb[27].mxu0 }
0x11ae   :  { %v1391_v41 = vpop.f32.mrb[24].mxu1 }
0x11af   :  { %2029 = vtanh.f32 %v1305_v26  ;;  %v1392_v0 = vadd.f32 %v1391_v41, %v1350_v35  ;;  %v1894_v34 = vpop.f32.mrb[25].mxu1  ;;  %v1725_v20 = vmul.f32 -1.442695, %v1305_v26  ;;  %v2856_v35 = vsel %vm1244_vm15, %v2778_v17, %v2774_v12 }
0x11b0   :  { %v1394_v1 = vpop.f32.mrb[26].mxu1 }
0x11b1   :  { %v1397_v47 = vadd.f32 %v2834_v50, %v1392_v0  ;;  %v1895_v49 = vpop.f32.mrb[27].mxu1 }
0x11b3   :  { %2031 = vtanh.f32 %v1397_v47  ;;  %v1728_v2 = vmul.f32 -1.442695, %v1397_v47 }
0x11b4   :  { %2033 = vpow2.f32 %v1725_v20 }
0x11b5   :  { %2035 = vpow2.f32 %v1728_v2  ;;  %v1531_v2 = vld [vmem:[#allocation9] sm:$0x1] }
0x11b9   :  { %v2030_v51 = vpop.eup %2029 }
0x11ba   :  { %1315 = vrot.lane.b32.xlu1 %v2030_v51, %s2190_s0 }
0x11bd   :  { %v2032_v8 = vpop.eup %2031 }
0x11be   :  { %1407 = vrot.lane.b32.xlu0 %v2032_v8, %s2190_s0  ;;  %v2034_v43 = vpop.eup %2033  ;;  %v1440_v8 = vld [vmem:[#allocation6 + $0x7] sm:$0x1] }
0x11bf   :  { %v1309_v25 = vadd.f32 1.0, %v2034_v43  ;;  %v2036_v56 = vpop.eup %2035  ;;  %v1442_v20 = vunpack.c.l.bf16 %v1440_v8 }
0x11c0   :  { %v1401_v28 = vadd.f32 1.0, %v2036_v56 }
0x11c1   :  { %2037 = vrcp.f32 %v1309_v25 }
0x11c2   :  { %2039 = vrcp.f32 %v1401_v28  ;;  %v1533_v28 = vunpack.c.l.bf16 %v1531_v2 }
0x11cb   :  { %v2038_v33 = vpop.eup %2037 }
0x11cc   :  { %v2040_v5 = vpop.eup %2039  ;;  %v1313_v15 = vmul.f32 %v2038_v33, %v2847_v30 }
0x122c   :  { %v1316_v4 = vpop.permute.xlu1 %1315 }
0x122d   :  { %v1318_v62 = vmul.f32 %v2038_v33, %v1316_v4 }
0x122f   :  { %1320 = vrot.lane.b32.xlu1 %v1318_v62, %s2194_s24 }
0x1230   :  { %v1408_v13 = vpop.permute.xlu0 %1407 }
0x1231   :  { %v1410_v63 = vmul.f32 %v2040_v5, %v1408_v13 }
0x1233   :  { %1412 = vrot.lane.b32.xlu0 %v1410_v63, %s2194_s24  ;;  %1334 = vperm.xlu1 %1928, %v2454_v52  }
0x1237   :  { %1426 = vperm.xlu0 %1927, %v2448_v48   ;;  %v1405_v48 = vmul.f32 %v2040_v5, %v2856_v35 }
0x12a1   :  { %v1321_v16 = vpop.permute.xlu1 %1320 }
0x12a2   :  { %v2850_v32 = vadd.f32 %v1321_v16, %v1313_v15 }
0x12a4   :  { %2041 = vtanh.f32 %v2850_v32 }
0x12a5   :  { %v1413_v52 = vpop.permute.xlu0 %1412 }
0x12a6   :  { %v2860_v38 = vadd.f32 %v1413_v52, %v1405_v48 }
0x12a8   :  { %2043 = vtanh.f32 %v2860_v38 }
0x12ae   :  { %v2042_v29 = vpop.eup %2041 }
0x12af   :  { %1326 = vrot.lane.b32.xlu1 %v2042_v29, %s2190_s0 }
0x12b2   :  { %v2044_v36 = vpop.eup %2043  ;;  %v2865_v26 = vpop.permute.xlu1 %1334 }
0x12b3   :  { %1418 = vrot.lane.b32.xlu0 %v2044_v36, %s2190_s0  ;;  %vm1336_vm1 = vcmp.eq.s32.totalorder %v2865_v26, 1 }
0x12b4   :  { %v1345_v2 = vsel %vm1336_vm1, %v2850_v32, %v2847_v30  ;;  %v206_v30 = vsel %vm205_vm5, %v2405_v60, 0.0  ;;  %v321_v32 = vsel %vm320_vm6, %v2415_v6, 0.0  ;;  %v601_v60 = vsel %vm600_vm13, %v2563_v7, 0.0 }
0x12b5   :  { %v785_v6 = vsel %vm784_vm4, %v2643_v21, 0.0 }
0x12b6   :  { %v2867_v11 = vpop.permute.xlu0 %1426 }
0x12b7   :  { %vm1428_vm3 = vcmp.eq.s32.totalorder %v2867_v11, 1 }
0x1321   :  { %v1327_v12 = vpop.permute.xlu1 %1326 }
0x1322   :  { %v2869_v17 = vmul.f32 %v2038_v33, %v1327_v12 }
0x1324   :  { %v2876_v41 = vsel %vm1336_vm1, %v2869_v17, %v2794_v42  ;;  %v1337_v23 = vsel %vm1336_vm1, %v2869_v17, 0.0 }
0x1325   :  { %v1419_v0 = vpop.permute.xlu0 %1418  ;;  %v1441_v34 = vpack.c.bf16 %v2876_v41, %v2876_v41 }
0x1326   :  { %v2880_v1 = vmul.f32 %v2040_v5, %v1419_v0 }
0x1327   :  { %1444 = vrot.lane.b32.xlu1 %v1441_v34, %s2194_s24 }
0x1328   :  { %v2888_v47 = vsel %vm1428_vm3, %v2880_v1, %v2806_v55  ;;  %v1429_v27 = vsel %vm1428_vm3, %v2880_v1, 0.0 }
0x1329   :  { %v1532_v42 = vpack.c.bf16 %v2888_v47, %v2888_v47 }
0x132b   :  { %1535 = vrot.lane.b32.xlu0 %v1532_v42, %s2194_s24 }
0x1399   :  { %v1445_v49 = vpop.permute.xlu1 %1444 }
0x139a   :  { %1901 = vmatmul.mubr.msk.bf16.vlgmr.msra.gmra.mrb[28].mxu0 %vm120_vm2, %v1445_v49 }
0x139d   :  { %v1536_v51 = vpop.permute.xlu0 %1535 }
0x139e   :  { %1909 = vmatmul.mubr.msk.bf16.vlgmr.msra.gmra.mrb[28].mxu1 %vm120_vm2, %v1536_v51 }
0x146d   :  { %v1483_v43 = vpop.f32.mrb[28].mxu0 }
0x146e   :  { %v1484_v25 = vadd.f32 %v1483_v43, %v1442_v20  ;;  %v1902_v56 = vpop.f32.mrb[29].mxu0 }
0x146f   :  { %v1486_v55 = vpop.f32.mrb[30].mxu0 }
0x1470   :  { %v1489_v33 = vadd.f32 %v2828_v19, %v1484_v25  ;;  %v1903_v4 = vpop.f32.mrb[31].mxu0 }
0x1471   :  { %v1574_v62 = vpop.f32.mrb[28].mxu1 }
0x1472   :  { %2045 = vtanh.f32 %v1489_v33  ;;  %v1575_v5 = vadd.f32 %v1574_v62, %v1533_v28  ;;  %v1910_v13 = vpop.f32.mrb[29].mxu1  ;;  %v1731_v29 = vmul.f32 -1.442695, %v1489_v33  ;;  %v1437_v28 = vsel %vm1428_vm3, %v2860_v38, %v2856_v35 }
0x1473   :  { %v1577_v63 = vpop.f32.mrb[30].mxu1  ;;  %v417_v35 = vsel %vm416_vm9, %v2483_v54, 0.0  ;;  %v1061_v54 = vsel %vm1060_vm11, %v2726_v31, 0.0 }
0x1474   :  { %v1580_v15 = vadd.f32 %v2834_v50, %v1575_v5  ;;  %v1911_v16 = vpop.f32.mrb[31].mxu1 }
0x1476   :  { %2047 = vtanh.f32 %v1580_v15  ;;  %v1734_v36 = vmul.f32 -1.442695, %v1580_v15 }
0x1477   :  { %2049 = vpow2.f32 %v1731_v29 }
0x1478   :  { %2051 = vpow2.f32 %v1734_v36 }
0x147c   :  { %v2046_v48 = vpop.eup %2045 }
0x147d   :  { %1499 = vrot.lane.b32.xlu1 %v2046_v48, %s2190_s0 }
0x1480   :  { %v2048_v52 = vpop.eup %2047 }
0x1481   :  { %1590 = vrot.lane.b32.xlu0 %v2048_v52, %s2190_s0  ;;  %v2050_v19 = vpop.eup %2049 }
0x1482   :  { %v1493_v12 = vadd.f32 1.0, %v2050_v19  ;;  %v2052_v0 = vpop.eup %2051 }
0x1483   :  { %v1584_v34 = vadd.f32 1.0, %v2052_v0 }
0x1484   :  { %2053 = vrcp.f32 %v1493_v12 }
0x1485   :  { %2055 = vrcp.f32 %v1584_v34 }
0x148e   :  { %v2054_v42 = vpop.eup %2053 }
0x148f   :  { %v2056_v51 = vpop.eup %2055  ;;  %v1497_v43 = vmul.f32 %v2054_v42, %v1345_v2 }
0x1490   :  { %v1588_v55 = vmul.f32 %v2056_v51, %v1437_v28 }
0x14ef   :  { %v1500_v50 = vpop.permute.xlu1 %1499 }
0x14f0   :  { %v1502_v49 = vmul.f32 %v2054_v42, %v1500_v50 }
0x14f2   :  { %1504 = vrot.lane.b32.xlu1 %v1502_v49, %s2194_s24 }
0x14f3   :  { %v1591_v8 = vpop.permute.xlu0 %1590 }
0x14f4   :  { %v1593_v20 = vmul.f32 %v2056_v51, %v1591_v8 }
0x14f6   :  { %1595 = vrot.lane.b32.xlu0 %v1593_v20, %s2194_s24  ;;  %1518 = vperm.xlu1 %1928, %v2380_v46  }
0x14fa   :  { %1609 = vperm.xlu0 %1927, %v2374_v44  }
0x1564   :  { %v1505_v25 = vpop.permute.xlu1 %1504 }
0x1565   :  { %v1507_v56 = vadd.f32 %v1505_v25, %v1497_v43 }
0x1567   :  { %2057 = vtanh.f32 %v1507_v56 }
0x1568   :  { %v1596_v33 = vpop.permute.xlu0 %1595 }
0x1569   :  { %v1598_v4 = vadd.f32 %v1596_v33, %v1588_v55 }
0x156b   :  { %2059 = vtanh.f32 %v1598_v4 }
0x1571   :  { %v2058_v46 = vpop.eup %2057 }
0x1572   :  { %1510 = vrot.lane.b32.xlu1 %v2058_v46, %s2190_s0 }
0x1575   :  { %v2060_v44 = vpop.eup %2059  ;;  %v1519_v7 = vpop.permute.xlu1 %1518 }
0x1576   :  { %1601 = vrot.lane.b32.xlu0 %v2060_v44, %s2190_s0  ;;  %208 = vrot.lane.b32.xlu1 %v206_v30, %s2194_s24  ;;  %vm1520_vm2 = vcmp.eq.s32.totalorder %v1519_v7, 1 }
0x1577   :  { %v1529_v39 = vsel %vm1520_vm2, %v1507_v56, %v1345_v2 }
0x1579   :  { %v1610_v40 = vpop.permute.xlu0 %1609 }
0x157a   :  { %323 = vrot.lane.b32.xlu0 %v321_v32, %s2194_s24  ;;  %419 = vrot.lane.b32.xlu1 %v417_v35, %s2194_s24  ;;  %vm1611_vm5 = vcmp.eq.s32.totalorder %v1610_v40, 1 }
0x157b   :  { %v1619_v38 = vsel %vm1611_vm5, %v1598_v4, %v1437_v28 }
0x157e   :  { %511 = vrot.lane.b32.xlu0 %v509_v58, %s2194_s24  ;;  %603 = vrot.lane.b32.xlu1 %v601_v60, %s2194_s24 }
0x1582   :  { %695 = vrot.lane.b32.xlu0 %v693_v57, %s2194_s24  ;;  %787 = vrot.lane.b32.xlu1 %v785_v6, %s2194_s24 }
0x1586   :  { %879 = vrot.lane.b32.xlu0 %v877_v9, %s2194_s24  ;;  %971 = vrot.lane.b32.xlu1 %v969_v10, %s2194_s24 }
0x158a   :  { %1063 = vrot.lane.b32.xlu0 %v1061_v54, %s2194_s24  ;;  %1155 = vrot.lane.b32.xlu1 %v1153_v14, %s2194_s24 }
0x158e   :  { %1247 = vrot.lane.b32.xlu0 %v1245_v22, %s2194_s24  ;;  %1339 = vrot.lane.b32.xlu1 %v1337_v23, %s2194_s24 }
0x1592   :  { %1431 = vrot.lane.b32.xlu0 %v1429_v27, %s2194_s24 }
0x1596   :  { %1626 = vrot.lane.b32.xlu0 %v1529_v39, %s2196_s2 }
0x15e4   :  { %v1511_v21 = vpop.permute.xlu1 %1510 }
0x15e5   :  { %v1513_v45 = vmul.f32 %v2054_v42, %v1511_v21 }
0x15e7   :  { %v1521_v59 = vsel %vm1520_vm2, %v1513_v45, 0.0  ;;  %v1528_v3 = vsel %vm1520_vm2, %v1513_v45, %v2876_v41 }
0x15e8   :  { %v1602_v61 = vpop.permute.xlu0 %1601  ;;  %1523 = vrot.lane.b32.xlu1 %v1521_v59, %s2194_s24  ;;  %v209_v37 = vpop.permute.xlu1 %208 }
0x15e9   :  { %v1604_v31 = vmul.f32 %v2056_v51, %v1602_v61  ;;  %212 = vst.msk [vmem:[#allocation12] sm:$0x3] %vm84_vm0, %v209_v37 }
0x15eb   :  { %v1612_v18 = vsel %vm1611_vm5, %v1604_v31, 0.0  ;;  %v1618_v26 = vsel %vm1611_vm5, %v1604_v31, %v2888_v47 }
0x15ec   :  { %v324_v53 = vpop.permute.xlu0 %323  ;;  %1614 = vrot.lane.b32.xlu0 %v1612_v18, %s2194_s24  ;;  %1621 = vrot.lane.b32.xlu1 %v1528_v3, %s2194_s24  ;;  %v420_v24 = vpop.permute.xlu1 %419 }
0x15ed   :  { %327 = vst.msk [vmem:[#allocation13 + $0xe] sm:$0x3] %vm84_vm0, %v324_v53  ;;  %423 = vst.msk [vmem:[#allocation12 + $0x2] sm:$0x3] %vm84_vm0, %v420_v24 }
0x15f0   :  { %v512_v11 = vpop.permute.xlu0 %511  ;;  %1636 = vrot.lane.b32.xlu0 %v1619_v38, %s2196_s2  ;;  %1631 = vrot.lane.b32.xlu1 %v1618_v26, %s2194_s24  ;;  %v604_v17 = vpop.permute.xlu1 %603 }
0x15f1   :  { %515 = vst.msk [vmem:[#allocation13 + $0xc] sm:$0x3] %vm84_vm0, %v512_v11  ;;  %607 = vst.msk [vmem:[#allocation12 + $0x4] sm:$0x3] %vm84_vm0, %v604_v17 }
0x15f4   :  { %v696_v41 = vpop.permute.xlu0 %695  ;;  %v788_v1 = vpop.permute.xlu1 %787 }
0x15f5   :  { %699 = vst.msk [vmem:[#allocation13 + $0xa] sm:$0x3] %vm84_vm0, %v696_v41  ;;  %791 = vst.msk [vmem:[#allocation12 + $0x6] sm:$0x3] %vm84_vm0, %v788_v1 }
0x15f8   :  { %v880_v62 = vpop.permute.xlu0 %879  ;;  %v972_v5 = vpop.permute.xlu1 %971 }
0x15f9   :  { %883 = vst.msk [vmem:[#allocation13 + $0x8] sm:$0x3] %vm84_vm0, %v880_v62  ;;  %975 = vst.msk [vmem:[#allocation12 + $0x8] sm:$0x3] %vm84_vm0, %v972_v5 }
0x15fc   :  { %v1064_v47 = vpop.permute.xlu0 %1063  ;;  %v1156_v13 = vpop.permute.xlu1 %1155 }
0x15fd   :  { %1067 = vst.msk [vmem:[#allocation13 + $0x6] sm:$0x3] %vm84_vm0, %v1064_v47  ;;  %1159 = vst.msk [vmem:[#allocation12 + $0xa] sm:$0x3] %vm84_vm0, %v1156_v13 }
0x1600   :  { %v1248_v63 = vpop.permute.xlu0 %1247  ;;  %v1340_v15 = vpop.permute.xlu1 %1339 }
0x1601   :  { %1251 = vst.msk [vmem:[#allocation13 + $0x4] sm:$0x3] %vm84_vm0, %v1248_v63  ;;  %1343 = vst.msk [vmem:[#allocation12 + $0xc] sm:$0x3] %vm84_vm0, %v1340_v15 }
0x1604   :  { %v1432_v16 = vpop.permute.xlu0 %1431 }
0x1605   :  { %1435 = vst.msk [vmem:[#allocation13 + $0x2] sm:$0x3] %vm84_vm0, %v1432_v16 }
0x1608   :  { %v1627_v48 = vpop.permute.xlu0 %1626 }
0x1609   :  { %1629 = vst.msk [vmem:[#allocation3] sm:$0x3] %vm84_vm0, %v1627_v48 }
0x165a   :  { %v1524_v52 = vpop.permute.xlu1 %1523 }
0x165b   :  { %1527 = vst.msk [vmem:[#allocation12 + $0xe] sm:$0x3] %vm84_vm0, %v1524_v52 }
0x165c   :  { %2144 = shalt.err (!%p2141_p0)
}
0x165d   :  { %s2145_s17 = scalar_lea.hbm %s3032_s7, 256 }
0x165e   :  { %p2146_p1 = scmp.ne.s32.totalorder %s3032_s7, %s2145_s17  ;;  %p2149_p2 = scmp.lt.u32.totalorder %s2145_s17, %s3032_s7 }
0x1660   :  { %p2151_p3 = pnand %p2149_p2, %p2146_p1 }
0x1662   :  { %2154 = shalt.err (!%p2151_p3)
}
0x1663   :  { %s2199_s23 = smov 2   ;;  %v1615_v29 = vpop.permute.xlu0 %1614  ;;  %v1622_v36 = vpop.permute.xlu1 %1621  ;;  %s2155_s27 = scalar_lea.vmem %s1662_s19, 256 }
0x1664   :  { %1651 = dma.vmem_to_hbm [thread:$0]  %s1646_s4, 256, %s3032_s7, [#allocation8], %s2194_s24, %s2194_s24, %s2199_s23   ;;  %1617 = vst.msk [vmem:[#allocation13] sm:$0x3] %vm84_vm0, %v1615_v29  ;;  %1624 = vst.msk [vmem:[#allocation2] sm:$0x3] %vm84_vm0, %v1622_v36 }
0x1665   :  { %p2156_p4 = scmp.ne.s32.totalorder %s1662_s19, %s2155_s27  ;;  %p2160_p5 = scmp.lt.s32.totalorder %s1662_s19, %s1662_s19 }
0x1666   :  { %p2161_p6 = scmp.lt.s32.totalorder %s2155_s27, %s2155_s27 }
0x1668   :  { %p2162_p7 = por %p2161_p6, %p2160_p5 }
0x166a   :  { %p2163_p8 = pnand %p2162_p7, %p2156_p4 }
0x166c   :  { %2166 = shalt.err (!%p2163_p8)
}
0x166d   :  { %s2167_s28 = scalar_lea.hbm %s3033_s8, 256 }
0x166e   :  { %p2168_p9 = scmp.ne.s32.totalorder %s3033_s8, %s2167_s28  ;;  %p2171_p10 = scmp.lt.u32.totalorder %s2167_s28, %s3033_s8 }
0x1670   :  { %p2173_p11 = pnand %p2171_p10, %p2168_p9 }
0x1672   :  { %2176 = shalt.err (!%p2173_p11)
}
0x1673   :  { %1667 = dma.vmem_to_hbm [thread:$0]  %s1662_s19, 256, %s3033_s8, [#allocation14], %s2194_s24, %s2194_s24, %s2199_s23   ;;  %v1637_v19 = vpop.permute.xlu0 %1636  ;;  %v1632_v12 = vpop.permute.xlu1 %1631 }
0x1674   :  { %1639 = vst.msk [vmem:[#allocation5] sm:$0x3] %vm84_vm0, %v1637_v19  ;;  %1634 = vst.msk [vmem:[#allocation4] sm:$0x3] %vm84_vm0, %v1632_v12 }
0x1675   :  { %2181 = dma.done.wait [#allocation8], 256  }
0x1676   :  { %2182 = vsyncadd [#allocation8], 4294967040 }
0x1677   :  { %2183 = dma.done.wait [#allocation14], 256  }
0x1678   :  { %2184 = vsyncadd [#allocation14], 4294967040 }
0x1679   :  { %1674 = vsyncpa [#allocation7], 1 }
0x167a   :  { %1675 = vsyncpa [#allocation10], 1 }
0x167b   :  { %1676 = vsyncpa [#allocation8], 1 }
0x167c   :  { %1677 = vsyncpa [#allocation14], 1 }

</bundles_post_ra>
